<compile_context>
chip_gen: v7x
topology: tpu7x:2x2x1
jax: 0.10.0
libtpu: 0.0.40
codegen_flags: <defaults>
</compile_context>

<pallas_src>
import jax
import jax.numpy as jnp
from jax import lax
from jax.experimental import pallas as pl
from jax.experimental.pallas import tpu as pltpu

KSIZE = 3    # 3x3 depthwise kernel, padding 1, stride 1
LANE = 128   # TPU lane width


def _dwconv_kernel(x_ref, up_ref, dn_ref, w_ref, b_ref, o_ref):
    # x_ref : (1, tH, W, C)  current row-tile of the image
    # up_ref: (1, 1,  W, C)  image row just above the tile (clamped dup at top edge)
    # dn_ref: (1, 1,  W, C)  image row just below the tile (clamped dup at bottom edge)
    # w_ref : (3, 3, C)      depthwise taps (kh, kw, C)
    # b_ref : (1, C)         bias
    # o_ref : (1, tH, W, C)
    i = pl.program_id(1)
    n_h = pl.num_programs(1)
    _, tH, W, C = o_ref.shape

    x = x_ref[0]                                                     # (tH, W, C)
    # Halo rows: zero them at the image top/bottom (they are clamped duplicates).
    top = jnp.where(i > 0, up_ref[0, 0], jnp.zeros_like(up_ref[0, 0]))
    bot = jnp.where(i < n_h - 1, dn_ref[0, 0], jnp.zeros_like(dn_ref[0, 0]))

    # Extended strip covering image rows [tile_start-1, tile_end+1).
    # TODO(synk): drop this concat (add the halo-row taps to output rows 0 and
    # tH-1 separately) to save one tile-sized VMEM copy per step (v5e vst slot).
    # TODO(synk): for bf16 activations on v6e/v7x, keep the tap multiplies in
    # bf16 (this kernel is VALU-bound there); v5e has no bf16 VALU, keep f32.
    xe = jnp.concatenate([top[None], x, bot[None]], axis=0).astype(jnp.float32)

    # Width shifts hoisted out of the kh loop: 2 XLU rolls total (was 6).
    xe_l = pltpu.roll(xe, shift=1, axis=1)       # column x-1 at column x (col 0 wraps)
    xe_r = pltpu.roll(xe, shift=W - 1, axis=1)   # column x+1 at column x (col W-1 wraps)

    w = w_ref[...].astype(jnp.float32)           # (3, 3, C)
    # Column masks fold the image's width zero-padding into the taps; the six
    # masked tap planes are built once per grid step, outside the kh loop.
    col = lax.broadcasted_iota(jnp.int32, (1, W, C), 1)
    not_first = (col >= 1).astype(jnp.float32)       # kills wrapped col 0   (left roll)
    not_last = (col <= W - 2).astype(jnp.float32)    # kills wrapped col W-1 (right roll)
    taps_c = [w[kh, 1] for kh in range(KSIZE)]                 # (C,)
    taps_l = [not_first * w[kh, 0] for kh in range(KSIZE)]     # (1, W, C)
    taps_r = [not_last * w[kh, 2] for kh in range(KSIZE)]      # (1, W, C)

    # f32 accumulator seeded with the bias broadcast (saves a zero-fill + add).
    acc = jnp.broadcast_to(b_ref[0].astype(jnp.float32), (tH, W, C))
    for kh in range(KSIZE):
        # Row (kh) shifts are leading-axis slices of xe -> pure address offsets.
        acc = acc + xe[kh:kh + tH] * taps_c[kh]
        acc = acc + xe_l[kh:kh + tH] * taps_l[kh]
        acc = acc + xe_r[kh:kh + tH] * taps_r[kh]

    o_ref[0] = acc.astype(o_ref.dtype)


def _vmem_capacity_bytes():
    try:
        return int(pltpu.get_tpu_info().vmem_capacity_bytes)
    except Exception:
        return 64 << 20   # assume the smallest per-core VMEM of current gens (v7x)


def _pick_tile_h(N, H, W, C, itemsize):
    """Largest multiple-of-8 row tile dividing H that fits a VMEM budget while
    keeping >= ~4 grid steps for DMA pipelining / both v7x TensorCores."""
    vmem = _vmem_capacity_bytes()
    # Per-row working set: double-buffered in+out blocks (~4 copies in the
    # activation dtype) plus ~6 tile-sized f32 temporaries inside the kernel
    # (xe, two rolled copies, accumulator, slack).
    per_row = W * C * (4 * itemsize + 6 * 4)
    cap_rows = max(8, (vmem // 4) // max(per_row, 1))
    cands = [t for t in range(8, H + 1, 8) if H % t == 0] or [H]
    fitting = [t for t in cands if t <= cap_rows] or [min(cands)]
    stepped = [t for t in fitting if N * (H // t) >= 4]
    return max(stepped) if stepped else max(fitting)


def dwconv_nhwc(x_nhwc, weight, bias, *, tile_h=None):
    """Depthwise 3x3 conv, stride 1, 'same' padding, NHWC activations.

    x_nhwc : (N, H, W, C)
    weight : (3, 3, C)   (PyTorch (C,1,3,3) stored channel-last)
    bias   : (C,)
    returns (N, H, W, C)
    """
    N, H, W, C = x_nhwc.shape
    itemsize = jnp.dtype(x_nhwc.dtype).itemsize

    # Lane-dense channels: pad C to a multiple of 128 so output stores are full
    # (unmasked) vst; padded channels carry zero taps/bias and are sliced off.
    Cp = C + (-C) % LANE
    # Zero rows below the image are numerically identical to the conv's own
    # 'same' padding, so padding H up to a tile multiple is exact.
    Hp = H + (-H) % 8
    if tile_h is None:
        tile_h = _pick_tile_h(N, Hp, W, Cp, itemsize)
    Hp = Hp + (-Hp) % tile_h
    n_h = Hp // tile_h

    xp, wp, bp = x_nhwc, weight, bias
    if (Hp, Cp) != (H, C):
        xp = jnp.pad(x_nhwc, ((0, 0), (0, Hp - H), (0, 0), (0, Cp - C)))
        wp = jnp.pad(weight, ((0, 0), (0, 0), (0, Cp - C)))
        bp = jnp.pad(bias, ((0, Cp - C),))
    bias2d = bp.reshape(1, Cp)

    # Explicit VMEM budget so the larger tiles aren't rejected by the default
    # scoped limit (16 MiB v5e / 32 MiB v6e,v7x); capped below physical VMEM.
    tile_bytes = tile_h * W * Cp * itemsize
    est = (4 * tile_bytes                        # double-buffered in/out blocks
           + 6 * tile_h * W * Cp * 4             # in-kernel f32 temporaries
           + 8 * W * Cp * itemsize               # halo rows (double-buffered)
           + 2 * (KSIZE * KSIZE + 1) * Cp * 4)   # taps + bias
    vmem_limit = int(min(_vmem_capacity_bytes() * 3 // 4, max(2 * est, 32 << 20)))

    # TODO(synk): tile W (with column halos) as well for very wide feature maps.

    def main_map(n, i):
        return (n, i, 0, 0)

    def up_map(n, i):
        # Row just above the tile; clamped at the top (zeroed inside the kernel).
        return (n, jnp.maximum(i * tile_h - 1, 0), 0, 0)

    def dn_map(n, i):
        # Row just below the tile; clamped at the bottom (zeroed inside the kernel).
        return (n, jnp.minimum((i + 1) * tile_h, Hp - 1), 0, 0)

    out = pl.pallas_call(
        _dwconv_kernel,
        out_shape=jax.ShapeDtypeStruct((N, Hp, W, Cp), x_nhwc.dtype),
        grid_spec=pltpu.PrefetchScalarGridSpec(
            num_scalar_prefetch=0,
            grid=(N, n_h),
            in_specs=[
                pl.BlockSpec((1, tile_h, W, Cp), main_map),   # tile rows
                pl.BlockSpec((1, 1, W, Cp), up_map),          # top halo row
                pl.BlockSpec((1, 1, W, Cp), dn_map),          # bottom halo row
                pl.BlockSpec((KSIZE, KSIZE, Cp), lambda n, i: (0, 0, 0)),  # taps
                pl.BlockSpec((1, Cp), lambda n, i: (0, 0)),                # bias
            ],
            out_specs=pl.BlockSpec((1, tile_h, W, Cp), main_map),
        ),
        compiler_params=pltpu.CompilerParams(
            dimension_semantics=("parallel", "parallel"),
            vmem_limit_bytes=vmem_limit),
    )(xp, xp, xp, wp, bias2d)

    if (Hp, Cp) != (H, C):
        out = out[:, :H, :, :C]
    return out


def dwconv_nchw(x_nchw, weight, bias):
    """Compatibility adapter for PyTorch's NCHW convention.

    Prefer calling dwconv_nhwc directly and keeping activations NHWC end-to-end:
    each transpose here is a full HBM round-trip for a memory-bound op."""
    x_nhwc = jnp.transpose(x_nchw, (0, 2, 3, 1))
    return jnp.transpose(dwconv_nhwc(x_nhwc, weight, bias), (0, 3, 1, 2))


def init_params(key, dim):
    """Deterministic init mirroring nn.Conv2d(dim, dim, 3, groups=dim, bias=True).

    PyTorch weight shape (dim, 1, 3, 3) -> stored here as (3, 3, dim)."""
    kw, kb = jax.random.split(key)
    fan_in = 1 * KSIZE * KSIZE  # in_channels/groups * kH * kW
    bound = 1.0 / (fan_in ** 0.5)
    weight = jax.random.uniform(kw, (KSIZE, KSIZE, dim), jnp.float32,
                                minval=-bound, maxval=bound)
    bias = jax.random.uniform(kb, (dim,), jnp.float32,
                              minval=-bound, maxval=bound)
    return weight, bias


def _reference_nhwc(x_nhwc, weight, bias):
    # lax grouped conv for verification: weight (3,3,C) -> HWIO (3,3,1,C).
    C = weight.shape[-1]
    w_hwio = weight[:, :, None, :]
    y = lax.conv_general_dilated(
        x_nhwc, w_hwio, window_strides=(1, 1), padding=((1, 1), (1, 1)),
        dimension_numbers=("NHWC", "HWIO", "NHWC"),
        feature_group_count=C)
    return y + bias[None, None, None, :]


if __name__ == "__main__":
    key = jax.random.PRNGKey(0)
    k_x, k_p = jax.random.split(key)

    N, H, W, C = 2, 16, 16, 128  # dim=128 matches the module default
    x = jax.random.normal(k_x, (N, H, W, C), jnp.float32)   # NHWC hot-path layout
    weight, bias = init_params(k_p, C)

    y = jax.block_until_ready(dwconv_nhwc(x, weight, bias))
    y_ref = jax.block_until_ready(_reference_nhwc(x, weight, bias))

    assert y.shape == (N, H, W, C)
    assert jnp.allclose(y, y_ref, atol=1e-5, rtol=1e-5)

    print("KERNEL_OK")
</pallas_src>

<mosaic_0001>
module attributes {stable_mosaic.version = 11 : i64} {
  func.func @_dwconv_kernel(%arg0: i32, %arg1: i32, %arg2: memref<1x8x16x128xf32, #tpu.memory_space<vmem>>, %arg3: memref<1x1x16x128xf32, #tpu.memory_space<vmem>>, %arg4: memref<1x1x16x128xf32, #tpu.memory_space<vmem>>, %arg5: memref<3x3x128xf32, #tpu.memory_space<vmem>>, %arg6: memref<1x128xf32, #tpu.memory_space<vmem>>, %arg7: memref<1x8x16x128xf32, #tpu.memory_space<vmem>>) attributes {dimension_semantics = [#tpu.dimension_semantics<parallel>, #tpu.dimension_semantics<parallel>], iteration_bounds = array<i64: 2, 2>, scalar_prefetch = 0 : i64, scratch_operands = 0 : i64, tpu.core_type = #tpu.core_type<tc>, window_params = [{transform_indices = @transform_0, window_bounds = array<i64: 1, 8, 16, 128>}, {transform_indices = @transform_1, window_bounds = array<i64: 1, 1, 16, 128>}, {transform_indices = @transform_2, window_bounds = array<i64: 1, 1, 16, 128>}, {pipeline_mode = #tpu.pipeline_mode<synchronous>, transform_indices = @transform_3, window_bounds = array<i64: 3, 3, 128>}, {pipeline_mode = #tpu.pipeline_mode<synchronous>, transform_indices = @transform_4, window_bounds = array<i64: 1, 128>}, {transform_indices = @transform_5, window_bounds = array<i64: 1, 8, 16, 128>}]} {
    %c0 = arith.constant 0 : index
    %c0_0 = arith.constant 0 : index
    %c0_1 = arith.constant 0 : index
    %c0_2 = arith.constant 0 : index
    %0 = vector.load %arg2[%c0, %c0_0, %c0_1, %c0_2] : memref<1x8x16x128xf32, #tpu.memory_space<vmem>>, vector<1x8x16x128xf32>
    %1 = vector.shape_cast %0 : vector<1x8x16x128xf32> to vector<8x16x128xf32>
    %c0_i32 = arith.constant 0 : i32
    %2 = arith.cmpi sgt, %arg1, %c0_i32 : i32
    %c0_3 = arith.constant 0 : index
    %c0_4 = arith.constant 0 : index
    %c0_5 = arith.constant 0 : index
    %c0_6 = arith.constant 0 : index
    %3 = vector.load %arg3[%c0_3, %c0_4, %c0_5, %c0_6] : memref<1x1x16x128xf32, #tpu.memory_space<vmem>>, vector<1x1x16x128xf32>
    %4 = vector.shape_cast %3 : vector<1x1x16x128xf32> to vector<16x128xf32>
    %cst = arith.constant 0.000000e+00 : f32
    %5 = vector.broadcast %cst : f32 to vector<16x128xf32>
    %6 = arith.select %2, %4, %5 : vector<16x128xf32>
    %c1_i32 = arith.constant 1 : i32
    %7 = arith.cmpi slt, %arg1, %c1_i32 : i32
    %c0_7 = arith.constant 0 : index
    %c0_8 = arith.constant 0 : index
    %c0_9 = arith.constant 0 : index
    %c0_10 = arith.constant 0 : index
    %8 = vector.load %arg4[%c0_7, %c0_8, %c0_9, %c0_10] : memref<1x1x16x128xf32, #tpu.memory_space<vmem>>, vector<1x1x16x128xf32>
    %9 = vector.shape_cast %8 : vector<1x1x16x128xf32> to vector<16x128xf32>
    %cst_11 = arith.constant 0.000000e+00 : f32
    %10 = vector.broadcast %cst_11 : f32 to vector<16x128xf32>
    %11 = arith.select %7, %9, %10 : vector<16x128xf32>
    %12 = vector.shape_cast %6 : vector<16x128xf32> to vector<1x16x128xf32>
    %13 = vector.shape_cast %11 : vector<16x128xf32> to vector<1x16x128xf32>
    %14 = tpu.concatenate %12, %1, %13 in 0 : vector<1x16x128xf32>, vector<8x16x128xf32>, vector<1x16x128xf32> -> vector<10x16x128xf32>
    %c1_i32_12 = arith.constant 1 : i32
    %15 = tpu.dynamic_rotate %14 by %c1_i32_12 dim 1 : vector<10x16x128xf32>, i32 -> vector<10x16x128xf32>
    %c15_i32 = arith.constant 15 : i32
    %16 = tpu.dynamic_rotate %14 by %c15_i32 dim 1 : vector<10x16x128xf32>, i32 -> vector<10x16x128xf32>
    %c0_13 = arith.constant 0 : index
    %c0_14 = arith.constant 0 : index
    %c0_15 = arith.constant 0 : index
    %17 = vector.load %arg5[%c0_13, %c0_14, %c0_15] : memref<3x3x128xf32, #tpu.memory_space<vmem>>, vector<3x3x128xf32>
    %18 = tpu.iota {dimensions = array<i32: 1>} : vector<1x16x128xi32>
    %c1_i32_16 = arith.constant 1 : i32
    %19 = vector.broadcast %c1_i32_16 : i32 to vector<1x16x128xi32>
    %20 = arith.cmpi sge, %18, %19 : vector<1x16x128xi32>
    %21 = arith.extui %20 : vector<1x16x128xi1> to vector<1x16x128xi32>
    %22 = arith.sitofp %21 : vector<1x16x128xi32> to vector<1x16x128xf32>
    %c14_i32 = arith.constant 14 : i32
    %23 = vector.broadcast %c14_i32 : i32 to vector<1x16x128xi32>
    %24 = arith.cmpi sle, %18, %23 : vector<1x16x128xi32>
    %25 = arith.extui %24 : vector<1x16x128xi1> to vector<1x16x128xi32>
    %26 = arith.sitofp %25 : vector<1x16x128xi32> to vector<1x16x128xf32>
    %27 = vector.extract_strided_slice %17 {offsets = [0, 1, 0], sizes = [1, 1, 128], strides = [1, 1, 1]} : vector<3x3x128xf32> to vector<1x1x128xf32>
    %28 = vector.shape_cast %27 : vector<1x1x128xf32> to vector<128xf32>
    %29 = vector.extract_strided_slice %17 {offsets = [1, 1, 0], sizes = [1, 1, 128], strides = [1, 1, 1]} : vector<3x3x128xf32> to vector<1x1x128xf32>
    %30 = vector.shape_cast %29 : vector<1x1x128xf32> to vector<128xf32>
    %31 = vector.extract_strided_slice %17 {offsets = [2, 1, 0], sizes = [1, 1, 128], strides = [1, 1, 1]} : vector<3x3x128xf32> to vector<1x1x128xf32>
    %32 = vector.shape_cast %31 : vector<1x1x128xf32> to vector<128xf32>
    %33 = vector.extract_strided_slice %17 {offsets = [0, 0, 0], sizes = [1, 1, 128], strides = [1, 1, 1]} : vector<3x3x128xf32> to vector<1x1x128xf32>
    %34 = vector.shape_cast %33 : vector<1x1x128xf32> to vector<128xf32>
    %35 = vector.shape_cast %34 : vector<128xf32> to vector<1x1x128xf32>
    %36 = vector.broadcast %35 : vector<1x1x128xf32> to vector<1x16x128xf32>
    %37 = arith.mulf %22, %36 : vector<1x16x128xf32>
    %38 = vector.extract_strided_slice %17 {offsets = [1, 0, 0], sizes = [1, 1, 128], strides = [1, 1, 1]} : vector<3x3x128xf32> to vector<1x1x128xf32>
    %39 = vector.shape_cast %38 : vector<1x1x128xf32> to vector<128xf32>
    %40 = vector.shape_cast %39 : vector<128xf32> to vector<1x1x128xf32>
    %41 = vector.broadcast %40 : vector<1x1x128xf32> to vector<1x16x128xf32>
    %42 = arith.mulf %22, %41 : vector<1x16x128xf32>
    %43 = vector.extract_strided_slice %17 {offsets = [2, 0, 0], sizes = [1, 1, 128], strides = [1, 1, 1]} : vector<3x3x128xf32> to vector<1x1x128xf32>
    %44 = vector.shape_cast %43 : vector<1x1x128xf32> to vector<128xf32>
    %45 = vector.shape_cast %44 : vector<128xf32> to vector<1x1x128xf32>
    %46 = vector.broadcast %45 : vector<1x1x128xf32> to vector<1x16x128xf32>
    %47 = arith.mulf %22, %46 : vector<1x16x128xf32>
    %48 = vector.extract_strided_slice %17 {offsets = [0, 2, 0], sizes = [1, 1, 128], strides = [1, 1, 1]} : vector<3x3x128xf32> to vector<1x1x128xf32>
    %49 = vector.shape_cast %48 : vector<1x1x128xf32> to vector<128xf32>
    %50 = vector.shape_cast %49 : vector<128xf32> to vector<1x1x128xf32>
    %51 = vector.broadcast %50 : vector<1x1x128xf32> to vector<1x16x128xf32>
    %52 = arith.mulf %26, %51 : vector<1x16x128xf32>
    %53 = vector.extract_strided_slice %17 {offsets = [1, 2, 0], sizes = [1, 1, 128], strides = [1, 1, 1]} : vector<3x3x128xf32> to vector<1x1x128xf32>
    %54 = vector.shape_cast %53 : vector<1x1x128xf32> to vector<128xf32>
    %55 = vector.shape_cast %54 : vector<128xf32> to vector<1x1x128xf32>
    %56 = vector.broadcast %55 : vector<1x1x128xf32> to vector<1x16x128xf32>
    %57 = arith.mulf %26, %56 : vector<1x16x128xf32>
    %58 = vector.extract_strided_slice %17 {offsets = [2, 2, 0], sizes = [1, 1, 128], strides = [1, 1, 1]} : vector<3x3x128xf32> to vector<1x1x128xf32>
    %59 = vector.shape_cast %58 : vector<1x1x128xf32> to vector<128xf32>
    %60 = vector.shape_cast %59 : vector<128xf32> to vector<1x1x128xf32>
    %61 = vector.broadcast %60 : vector<1x1x128xf32> to vector<1x16x128xf32>
    %62 = arith.mulf %26, %61 : vector<1x16x128xf32>
    %c0_17 = arith.constant 0 : index
    %c0_18 = arith.constant 0 : index
    %63 = vector.load %arg6[%c0_17, %c0_18] : memref<1x128xf32, #tpu.memory_space<vmem>>, vector<1x128xf32>
    %64 = vector.shape_cast %63 : vector<1x128xf32> to vector<128xf32>
    %65 = vector.shape_cast %64 : vector<128xf32> to vector<1x1x128xf32>
    %66 = vector.broadcast %65 : vector<1x1x128xf32> to vector<8x16x128xf32>
    %67 = vector.extract_strided_slice %14 {offsets = [0, 0, 0], sizes = [8, 16, 128], strides = [1, 1, 1]} : vector<10x16x128xf32> to vector<8x16x128xf32>
    %68 = vector.shape_cast %28 : vector<128xf32> to vector<1x1x128xf32>
    %69 = vector.broadcast %68 : vector<1x1x128xf32> to vector<8x16x128xf32>
    %70 = arith.mulf %67, %69 : vector<8x16x128xf32>
    %71 = arith.addf %66, %70 : vector<8x16x128xf32>
    %72 = vector.extract_strided_slice %15 {offsets = [0, 0, 0], sizes = [8, 16, 128], strides = [1, 1, 1]} : vector<10x16x128xf32> to vector<8x16x128xf32>
    %73 = vector.broadcast %37 : vector<1x16x128xf32> to vector<8x16x128xf32>
    %74 = arith.mulf %72, %73 : vector<8x16x128xf32>
    %75 = arith.addf %71, %74 : vector<8x16x128xf32>
    %76 = vector.extract_strided_slice %16 {offsets = [0, 0, 0], sizes = [8, 16, 128], strides = [1, 1, 1]} : vector<10x16x128xf32> to vector<8x16x128xf32>
    %77 = vector.broadcast %52 : vector<1x16x128xf32> to vector<8x16x128xf32>
    %78 = arith.mulf %76, %77 : vector<8x16x128xf32>
    %79 = arith.addf %75, %78 : vector<8x16x128xf32>
    %80 = vector.extract_strided_slice %14 {offsets = [1, 0, 0], sizes = [8, 16, 128], strides = [1, 1, 1]} : vector<10x16x128xf32> to vector<8x16x128xf32>
    %81 = vector.shape_cast %30 : vector<128xf32> to vector<1x1x128xf32>
    %82 = vector.broadcast %81 : vector<1x1x128xf32> to vector<8x16x128xf32>
    %83 = arith.mulf %80, %82 : vector<8x16x128xf32>
    %84 = arith.addf %79, %83 : vector<8x16x128xf32>
    %85 = vector.extract_strided_slice %15 {offsets = [1, 0, 0], sizes = [8, 16, 128], strides = [1, 1, 1]} : vector<10x16x128xf32> to vector<8x16x128xf32>
    %86 = vector.broadcast %42 : vector<1x16x128xf32> to vector<8x16x128xf32>
    %87 = arith.mulf %85, %86 : vector<8x16x128xf32>
    %88 = arith.addf %84, %87 : vector<8x16x128xf32>
    %89 = vector.extract_strided_slice %16 {offsets = [1, 0, 0], sizes = [8, 16, 128], strides = [1, 1, 1]} : vector<10x16x128xf32> to vector<8x16x128xf32>
    %90 = vector.broadcast %57 : vector<1x16x128xf32> to vector<8x16x128xf32>
    %91 = arith.mulf %89, %90 : vector<8x16x128xf32>
    %92 = arith.addf %88, %91 : vector<8x16x128xf32>
    %93 = vector.extract_strided_slice %14 {offsets = [2, 0, 0], sizes = [8, 16, 128], strides = [1, 1, 1]} : vector<10x16x128xf32> to vector<8x16x128xf32>
    %94 = vector.shape_cast %32 : vector<128xf32> to vector<1x1x128xf32>
    %95 = vector.broadcast %94 : vector<1x1x128xf32> to vector<8x16x128xf32>
    %96 = arith.mulf %93, %95 : vector<8x16x128xf32>
    %97 = arith.addf %92, %96 : vector<8x16x128xf32>
    %98 = vector.extract_strided_slice %15 {offsets = [2, 0, 0], sizes = [8, 16, 128], strides = [1, 1, 1]} : vector<10x16x128xf32> to vector<8x16x128xf32>
    %99 = vector.broadcast %47 : vector<1x16x128xf32> to vector<8x16x128xf32>
    %100 = arith.mulf %98, %99 : vector<8x16x128xf32>
    %101 = arith.addf %97, %100 : vector<8x16x128xf32>
    %102 = vector.extract_strided_slice %16 {offsets = [2, 0, 0], sizes = [8, 16, 128], strides = [1, 1, 1]} : vector<10x16x128xf32> to vector<8x16x128xf32>
    %103 = vector.broadcast %62 : vector<1x16x128xf32> to vector<8x16x128xf32>
    %104 = arith.mulf %102, %103 : vector<8x16x128xf32>
    %105 = arith.addf %101, %104 : vector<8x16x128xf32>
    %c0_19 = arith.constant 0 : index
    %c0_20 = arith.constant 0 : index
    %c0_21 = arith.constant 0 : index
    %c0_22 = arith.constant 0 : index
    %106 = vector.load %arg7[%c0_19, %c0_20, %c0_21, %c0_22] : memref<1x8x16x128xf32, #tpu.memory_space<vmem>>, vector<1x8x16x128xf32>
    %107 = vector.shape_cast %106 : vector<1x8x16x128xf32> to vector<8x16x128xf32>
    %108 = vector.shape_cast %105 : vector<8x16x128xf32> to vector<1x8x16x128xf32>
    tpu.vector_store %arg7[%c0_19, %c0_20, %c0_21, %c0_22], %108 {strides = array<i32>} : memref<1x8x16x128xf32, #tpu.memory_space<vmem>>, vector<1x8x16x128xf32>,
    return
  }
  func.func @transform_0(%arg0: i32, %arg1: i32) -> (i32, i32, i32, i32) {
    %c0_i32 = arith.constant 0 : i32
    %c0_i32_0 = arith.constant 0 : i32
    %c0_i32_1 = arith.constant 0 : i32
    return %arg0, %arg1, %c0_i32, %c0_i32_0 : i32, i32, i32, i32
  }
  func.func @transform_1(%arg0: i32, %arg1: i32) -> (i32, i32, i32, i32) {
    %c8_i32 = arith.constant 8 : i32
    %0 = arith.muli %arg1, %c8_i32 : i32
    %c1_i32 = arith.constant 1 : i32
    %1 = arith.subi %0, %c1_i32 : i32
    %c0_i32 = arith.constant 0 : i32
    %2 = arith.maxsi %1, %c0_i32 : i32
    %c0_i32_0 = arith.constant 0 : i32
    %c0_i32_1 = arith.constant 0 : i32
    %c0_i32_2 = arith.constant 0 : i32
    return %arg0, %2, %c0_i32_0, %c0_i32_1 : i32, i32, i32, i32
  }
  func.func @transform_2(%arg0: i32, %arg1: i32) -> (i32, i32, i32, i32) {
    %c1_i32 = arith.constant 1 : i32
    %0 = arith.addi %arg1, %c1_i32 : i32
    %c8_i32 = arith.constant 8 : i32
    %1 = arith.muli %0, %c8_i32 : i32
    %c15_i32 = arith.constant 15 : i32
    %2 = arith.minsi %1, %c15_i32 : i32
    %c0_i32 = arith.constant 0 : i32
    %c0_i32_0 = arith.constant 0 : i32
    %c0_i32_1 = arith.constant 0 : i32
    return %arg0, %2, %c0_i32, %c0_i32_0 : i32, i32, i32, i32
  }
  func.func @transform_3(%arg0: i32, %arg1: i32) -> (i32, i32, i32) {
    %c0_i32 = arith.constant 0 : i32
    %c0_i32_0 = arith.constant 0 : i32
    %c0_i32_1 = arith.constant 0 : i32
    %c0_i32_2 = arith.constant 0 : i32
    return %c0_i32, %c0_i32_0, %c0_i32_1 : i32, i32, i32
  }
  func.func @transform_4(%arg0: i32, %arg1: i32) -> (i32, i32) {
    %c0_i32 = arith.constant 0 : i32
    %c0_i32_0 = arith.constant 0 : i32
    %c0_i32_1 = arith.constant 0 : i32
    return %c0_i32, %c0_i32_0 : i32, i32
  }
  func.func @transform_5(%arg0: i32, %arg1: i32) -> (i32, i32, i32, i32) {
    %c0_i32 = arith.constant 0 : i32
    %c0_i32_0 = arith.constant 0 : i32
    %c0_i32_1 = arith.constant 0 : i32
    return %arg0, %arg1, %c0_i32, %c0_i32_0 : i32, i32, i32, i32
  }
}

</mosaic_0001>

<bundles_post_ra>
// kernel: tpu_custom_call.1
= control target key start
LH: loop header
LB: loop body
LE: loop exit
PB: predicated region body
PF: predicated region fallthrough
CT: control target
= control target key end

     0   :  { %s2552_s0 = inlined_call_operand.hbm [shape: f32[2,16,16,128], index: 0, kind: input, shape index: {}]   ;;  %s2553_s1 = inlined_call_operand.hbm [shape: f32[2,16,16,128], index: 1, kind: input, shape index: {}]   ;;  %s2554_s2 = inlined_call_operand.hbm [shape: f32[2,16,16,128], index: 2, kind: input, shape index: {}]   ;;  %s2555_s3 = inlined_call_operand.hbm [shape: f32[3,3,128], index: 3, kind: input, shape index: {}]   ;;  %s2556_s4 = inlined_call_operand.vmem [shape: f32[1,128], index: 4, kind: input, shape index: {}]   ;;  %s2557_s5 = inlined_call_operand.hbm [shape: f32[2,16,16,128], index: 5, kind: output, shape index: {}]  }
   0x1   :  { %2584 = sst [smem:[#allocation32_spill]] %s2552_s0 }
   0x2   :  { %2585 = sst [smem:[#allocation33_spill]] %s2553_s1 }
   0x3   :  { %2586 = sst [smem:[#allocation34_spill]] %s2554_s2 }
   0x4   :  { %2587 = sst [smem:[#allocation35_spill]] %s2555_s3 }
   0x5   :  { %2588 = sst [smem:[#allocation36_spill]] %s2556_s4 }
   0x6   :  { %2589 = sst [smem:[#allocation37_spill]] %s2557_s5 }
   0x7   :  { %10 = vsyncpa [#allocation3], 0 }
   0x8   :  { %12 = vsyncpa [#allocation3 + $0x1], 0 }
   0x9   :  { %13 = vsyncpa [#allocation6], 0 }
   0xa   :  { %15 = vsyncpa [#allocation6 + $0x1], 0 }
   0xb   :  { %16 = vsyncpa [#allocation9], 0 }
   0xc   :  { %17 = vsyncpa [#allocation4], 0 }
   0xd   :  { %19 = vsyncpa [#allocation4 + $0x1], 0  ;;  %s1590_s18 = smov 0   ;;  %s1592_s19 = smov 0  }
   0xe   :  { %s1594_s20 = smov 0   ;;  %s1596_s21 = smov 0  }
   0xf   :  { %s1598_s22 = smov 0   ;;  %s1600_s23 = smov 0  }
  0x10   :  { %s1602_s24 = smov 0   ;;  %s1604_s25 = smov 0  }
  0x11   :  { %s1606_s26 = smov 0   ;;  %s1608_s27 = smov 0  }
  0x12   :  { %s1610_s28 = smov 0   ;;  %s1612_s29 = smov 0  }
  0x13   :  { %s1614_s30 = smov 0   ;;  %s1616_s6 = smov 0  }
  0x14 LB: > { %2590 = sst [smem:[#allocation16_spill]] %s1494_s18  ;;  %s34_s7 = sadd.s32 1, %s1538_s29  ;;  %s1546_s6 = sphi %s1616_s6, %s25_s6   ;;  %s1542_s30 = sphi %s1614_s30, %s2662_s30   ;;  %s1538_s29 = sphi %s1612_s29, %s2661_s29   ;;  %s1534_s28 = sphi %s1610_s28, %s2660_s28   ;;  %s1530_s27 = sphi %s1608_s27, %s2669_s27   ;;  %s1526_s26 = sphi %s1606_s26, %s2658_s26   ;;  %s1522_s25 = sphi %s1604_s25, %s2668_s25   ;;  %s1518_s24 = sphi %s1602_s24, %s2667_s24   ;;  %s1514_s23 = sphi %s1600_s23, %s2656_s23   ;;  %s1510_s22 = sphi %s1598_s22, %s2666_s22   ;;  %s1506_s21 = sphi %s1596_s21, %s2665_s21   ;;  %s1502_s20 = sphi %s1594_s20, %s2664_s20   ;;  %s1498_s19 = sphi %s1592_s19, %s2654_s19   ;;  %s1494_s18 = sphi %s1590_s18, %s2653_s18  }
  0x15   : > { %2591 = sst [smem:[#allocation17_spill]] %s1498_s19  ;;  %s37_s8 = sadd.s32 1, %s1542_s30 }
  0x16   : > { %2592 = sst [smem:[#allocation18_spill]] %s1502_s20  ;;  %p35_p0 = scmp.ge.s32.totalorder %s34_s7, 2 }
  0x17   : > { %2593 = sst [smem:[#allocation19_spill]] %s1514_s23  ;;  %p2569_p1 = scmp.eq.s32.totalorder %s1546_s6, 0 }
  0x18   : > { %2594 = sst [smem:[#allocation20_spill]] %s1526_s26  ;;  %s1055_s9 = sshll.u32 %s1538_s29, 3 }
  0x19   : > { %2595 = sst [smem:[#allocation21_spill]] %s1530_s27  ;;  %s82_s10 = sadd.s32 1, %s1514_s23 }
  0x1a   : > { %2596 = sst [smem:[#allocation22_spill]] %s1534_s28  ;;  %s2671_s7 = smov (%p35_p0, %s34_s7), 0 }
  0x1b   : > { %2597 = sst [smem:[#allocation23_spill]] %s1538_s29  ;;  %s2673_s8 = smov (!%p35_p0, %s37_s8), %s1542_s30 }
  0x1c   : > { %2598 = sst [smem:[#allocation24_spill]] %s1542_s30  ;;  %s42_s11 = ssub.s32 %s1538_s29, %s2671_s7 }
  0x1d   : > { %2599 = sst [smem:[#allocation25_spill]] %s2671_s7  ;;  %s1056_s12 = sadd.s32 4294967295, %s1055_s9 }
  0x1e   : > { %p39_p2 = scmp.ge.s32.totalorder %s2673_s8, 2  ;;  %p71_p3 = scmp.gt.s32.totalorder %s1056_s12, 0 }
  0x1f   : > { %s1057_s13 = sshll.u32 %s2671_s7, 3  ;;  %p89_p4 = scmp.ne.s32.totalorder %s1514_s23, %s1510_s22 }
  0x20   : > { %s2675_s8 = smov (%p39_p2, %s2673_s8), 0  ;;  %s2677_s12 = smov (!%p71_p3, %s1056_s12), 0 }
  0x21   : > { %2600 = sst [smem:[#allocation26_spill]] %s2675_s8  ;;  %s1677_s14 = ssub.s32 %s1542_s30, %s2675_s8 }
  0x22   : > { %2601 = sst [smem:[#allocation27_spill]] %s1677_s14  ;;  %s1058_s15 = sadd.s32 4294967295, %s1057_s13 }
  0x23   : > { %s1680_s16 = sor.u32 %s42_s11, %s1677_s14  ;;  %p75_p5 = scmp.gt.s32.totalorder %s1058_s15, 0 }
  0x24   : > { %p1685_p7 = por %p89_p4, %p2569_p1  ;;  %p95_p8 = scmp.ne.s32.totalorder %s1510_s22, %s1506_s21 }
  0x25   : > { %s2679_s15 = smov (!%p75_p5, %s1058_s15), 0  ;;  %s1691_s8 = sadd.s32 8, %s1055_s9 }
  0x26   : > { %2603 = sst [smem:[#allocation28_spill]] %s1691_s8  ;;  %s78_s7 = ssub.s32 %s2677_s12, %s2679_s15 }
  0x27   : > { %s79_s5 = sor.u32 %s78_s7, %s1677_s14  ;;  %s1695_s11 = sadd.s32 8, %s1057_s13 }
  0x28   : > { %p80_p10 = scmp.eq.s32.totalorder %s79_s5, 0  ;;  %p2568_p12 = scmp.lt.s32.totalorder %s1546_s6, 4 }
  0x29   : > { %s1703_s4 = sshll.u32 %s1542_s30, 5  ;;  %s265_s27 = sand.u32 1, %s1546_s6  }
  0x2a   : > { %s1700_s28 = scalar_select %p80_p10, %s1514_s23, %s82_s10  }
  0x2b   : > { %s267_s9 = sand.u32 1, %s1514_s23   ;;  %s1072_s18 = sshll.u32 %s2677_s12, 1 }
  0x2c   : > { %2604 = sst [smem:[#allocation29_spill]] %s1700_s28  ;;  %s1069_s2 = sshll.u32 %s267_s9, 4 }
  0x2d   : > { %s279_s15 = sadd.s32 %s1072_s18, %s1703_s4  ;;  %s269_s7 = scalar_lea.vmem [#allocation5], %s1069_s2 }
  0x2e   : > { %s1074_s19 = sshll.u32 %s279_s15, 7  ;;  %s282_s13 = sshll.u32 %s269_s7, 4  ;;  %s1713_s13 = int_to_ptr.vmem [resolvable:$true] %s282_s13 }
  0x2f   : > { %s2605_s1 = sld [smem:[#allocation33_spill]]  ;;  %p1719_p13 = pnand %p2568_p12, %p1685_p7 }
  0x30   : > { %s1723_s2 = scalar_lea.sflag [#allocation6], %s265_s27 }
  0x31   : > { %p1272_p2 = pneg %p1719_p13 }
  0x35   : > { %s1711_s20 = scalar_lea.hbm %s2605_s1, %s1074_s19  ;;  %s1275_s10 = scalar_lea.hbm %s2605_s1, 8192 }
  0x36   : > { %s1270_s18 = scalar_lea.hbm %s1711_s20, 256  ;;  %p1276_p5 = scmp.lt.u32.totalorder %s1711_s20, %s2605_s1 }
  0x37   : > { %p1271_p0 = scmp.ne.s32.totalorder %s1711_s20, %s1270_s18  ;;  %p1277_p7 = scmp.lt.u32.totalorder %s1275_s10, %s1270_s18 }
  0x38   : > { %p1279_p11 = scmp.lt.u32.totalorder %s1270_s18, %s1711_s20 }
  0x39   : > { %p1273_p3 = pnand %p1272_p2, %p1271_p0  ;;  %p1278_p10 = por %p1277_p7, %p1276_p5 }
  0x3b   : > { %p1274_p4 = pneg %p1273_p3  ;;  %p1280_p9 = por %p1279_p11, %p1278_p10 }
  0x3d   : > { %p1281_p12 = pnand %p1280_p9, %p1274_p4 }
  0x3f   : > { %1284 = shalt.err (!%p1281_p12)
}
  0x40   : > { %s1285_s27 = scalar_lea.vmem %s1713_s13, 256  ;;  %s1548_s17 = smov [#allocation5]  }
  0x41   : > { %p1286_p0 = scmp.ne.s32.totalorder %s1713_s13, %s1285_s27  ;;  %s1290_s9 = sshll.u32 %s1548_s17, 4  ;;  %s1291_s9 = int_to_ptr.vmem [resolvable:$false] %s1290_s9 }
  0x42   : > { %s1292_s15 = scalar_lea.vmem %s1291_s9, 512  ;;  %p1293_p6 = scmp.lt.s32.totalorder %s1713_s13, %s1291_s9 }
  0x43   : > { %p1288_p3 = pnand %p1286_p0, %p1272_p2  ;;  %p1294_p5 = scmp.lt.s32.totalorder %s1292_s15, %s1285_s27 }
  0x45   : > { %p1289_p1 = pneg %p1288_p3  ;;  %p1295_p7 = por %p1294_p5, %p1293_p6 }
  0x47   : > { %p1296_p11 = pnand %p1295_p7, %p1289_p1 }
  0x49   : > { %1299 = shalt.err (!%p1296_p11)
}
  0x4a   : > { %s2573_s7 = smov 128   ;;  %s2575_s18 = smov 8  }
  0x4b   : > { %1126 = dma.hbm_to_vmem [thread:$0]  (!%p1719_p13), %s1711_s20, 256, %s1713_s13, %s1723_s2, %s2573_s7, %s2573_s7, %s2575_s18  }
  0x4c   : > { %s1755_s19 = sadd.s32 4294967295, %s1546_s6   ;;  %p1061_p1 = scmp.ge.s32.totalorder %s1546_s6, 1 }
  0x4d   : > { %p2570_p6 = scmp.eq.s32.totalorder %s1755_s19, 0  ;;  %p212_p12 = scmp.lt.s32.totalorder %s1546_s6, 5 }
  0x4e   : > { %s1551_s20 = smov [#allocation8]   ;;  %s2610_s3 = sld [smem:[#allocation35_spill]] }
  0x4f   : > { %p1766_p2 = por %p95_p8, %p2570_p6  ;;  %p1770_p4 = pnand %p1061_p1, %p212_p12 }
  0x50   : > { %s224_s13 = sshll.u32 %s1551_s20, 4  ;;  %s225_s13 = int_to_ptr.vmem [resolvable:$true] %s224_s13 }
  0x51   : > { %s2607_s8 = scalar_select %p1766_p2, 1, 0 }
  0x52   : > { %s2608_s5 = scalar_select %p1770_p4, 1, 0 }
  0x53   : > { %p1116_p13 = pneg %p1770_p4 }
  0x54   : > { %s1300_s14 = scalar_lea.hbm %s2610_s3, 192 }
  0x55   : > { %p1778_p10 = pnand %p1116_p13, %p2570_p6  ;;  %p1301_p8 = scmp.ne.s32.totalorder %s2610_s3, %s1300_s14 }
  0x56   : > { %p1307_p7 = scmp.lt.u32.totalorder %s1300_s14, %s2610_s3 }
  0x57   : > { %p1302_p0 = pneg %p1778_p10 }
  0x59   : > { %p1303_p3 = pnand %p1302_p0, %p1301_p8 }
  0x5b   : > { %p1304_p5 = pneg %p1303_p3 }
  0x5d   : > { %p1309_p11 = pnand %p1307_p7, %p1304_p5 }
  0x5f   : > { %1312 = shalt.err (!%p1309_p11)
}
  0x60   : > { %s1313_s20 = scalar_lea.vmem %s225_s13, 192  ;;  %p1321_p9 = scmp.lt.s32.totalorder %s225_s13, %s225_s13 }
  0x61   : > { %p1314_p1 = scmp.ne.s32.totalorder %s225_s13, %s1313_s20  ;;  %p1322_p6 = scmp.lt.s32.totalorder %s1313_s20, %s1313_s20 }
  0x63   : > { %p1316_p12 = pnand %p1314_p1, %p1302_p0  ;;  %p1323_p2 = por %p1322_p6, %p1321_p9 }
  0x65   : > { %p1317_p13 = pneg %p1316_p12 }
  0x67   : > { %p1324_p4 = pnand %p1323_p2, %p1317_p13 }
  0x69   : > { %1327 = shalt.err (!%p1324_p4)
}
  0x6a   : > { %s1552_s21 = smov 64   ;;  %s1553_s12 = smov 4  }
  0x6b   : > { %1119 = dma.hbm_to_vmem [thread:$0]  (!%p1778_p10), %s2610_s3, 192, %s225_s13, [#allocation9], %s1552_s21, %s1552_s21, %s1553_s12  }
  0x6c   : > { %s1054_s17 = sadd.s32 4294967294, %s1546_s6   ;;  %s46_s9 = sadd.s32 1, %s1526_s26 }
  0x6d   : > { %p2611_p6 = scmp.eq.s32.totalorder %s1680_s16, 0  ;;  %p53_p9 = scmp.ne.s32.totalorder %s1526_s26, %s1522_s25 }
  0x6e   : > { %p59_p2 = scmp.ne.s32.totalorder %s1522_s25, %s1518_s24  ;;  %p205_p4 = scmp.eq.s32.totalorder %s1054_s17, 3 }
  0x6f   : > { %s1803_s15 = scalar_select %p2611_p6, %s1526_s26, %s46_s9  }
  0x70   : > { %s241_s20 = sand.u32 1, %s1526_s26   ;;  %p2613_p8 = scmp.eq.s32.totalorder %s1546_s6, 0 }
  0x71   : > { %2612 = sst [smem:[#allocation30_spill]] %s1803_s15  ;;  %p2614_p3 = scmp.eq.s32.totalorder %s1755_s19, 0 }
  0x72   : > { %p55_p0 = por %p2613_p8, %p53_p9  ;;  %p2616_p7 = scmp.eq.s32.totalorder %s1755_s19, 3 }
  0x73   : > { %p1814_p5 = por %p2614_p3, %p59_p2  ;;  %p1824_p10 = por %p205_p4, %p59_p2 }
  0x74   : > { %p1820_p11 = por %p2616_p7, %p53_p9  ;;  %s1064_s10 = sshll.u32 %s241_s20, 7 }
  0x75   : > { %s2618_s16 = scalar_select %p1824_p10, 1, 0 }
  0x76   : > { %s2617_s13 = scalar_select %p1820_p11, 1, 0 }
  0x77   : > { %2619 = sst [smem:[#allocation31_spill]] %s2618_s16  ;;  %s1100_s21 = sshll.u32 %s1538_s29, 4 }
  0x78   : > { %s252_s12 = sadd.s32 %s1100_s21, %s1703_s4  ;;  %s245_s14 = scalar_lea.vmem [#allocation2], %s1064_s10 }
  0x79   : > { %s255_s27 = sshll.u32 %s245_s14, 4  ;;  %s1068_s17 = sshll.u32 %s252_s12, 7  ;;  %s1830_s27 = int_to_ptr.vmem [resolvable:$true] %s255_s27 }
  0x7a   : > { %s2620_s0 = sld [smem:[#allocation32_spill]]  ;;  %p2621_p1 = scmp.lt.s32.totalorder %s1546_s6, 4 }
  0x7b   : > { %s1843_s10 = scalar_lea.sflag [#allocation3], %s241_s20 }
  0x7c   : > { %p1839_p12 = pnand %p2621_p1, %p55_p0 }
  0x7e   : > { %p1330_p6 = pneg %p1839_p12 }
  0x80   : > { %s1835_s1 = scalar_lea.hbm %s2620_s0, %s1068_s17  ;;  %s1333_s14 = scalar_lea.hbm %s2620_s0, 8192 }
  0x81   : > { %s1328_s21 = scalar_lea.hbm %s1835_s1, 2048  ;;  %p1334_p4 = scmp.lt.u32.totalorder %s1835_s1, %s2620_s0 }
  0x82   : > { %p1329_p13 = scmp.ne.s32.totalorder %s1835_s1, %s1328_s21  ;;  %p1335_p8 = scmp.lt.u32.totalorder %s1333_s14, %s1328_s21 }
  0x83   : > { %p1337_p3 = scmp.lt.u32.totalorder %s1328_s21, %s1835_s1 }
  0x84   : > { %p1331_p9 = pnand %p1330_p6, %p1329_p13  ;;  %p1336_p0 = por %p1335_p8, %p1334_p4 }
  0x86   : > { %p1332_p2 = pneg %p1331_p9  ;;  %p1338_p7 = por %p1337_p3, %p1336_p0 }
  0x88   : > { %p1339_p1 = pnand %p1338_p7, %p1332_p2 }
  0x8a   : > { %1342 = shalt.err (!%p1339_p1)
}
  0x8b   : > { %s1343_s20 = scalar_lea.vmem %s1830_s27, 2048  ;;  %s1554_s18 = smov [#allocation2]  }
  0x8c   : > { %p1344_p13 = scmp.ne.s32.totalorder %s1830_s27, %s1343_s20  ;;  %s1348_s12 = sshll.u32 %s1554_s18, 4  ;;  %s1349_s12 = int_to_ptr.vmem [resolvable:$false] %s1348_s12 }
  0x8d   : > { %s1350_s17 = scalar_lea.vmem %s1349_s12, 4096  ;;  %p1351_p11 = scmp.lt.s32.totalorder %s1830_s27, %s1349_s12 }
  0x8e   : > { %p1346_p9 = pnand %p1344_p13, %p1330_p6  ;;  %p1352_p4 = scmp.lt.s32.totalorder %s1350_s17, %s1343_s20 }
  0x90   : > { %p1347_p10 = pneg %p1346_p9  ;;  %p1353_p8 = por %p1352_p4, %p1351_p11 }
  0x92   : > { %p1354_p0 = pnand %p1353_p8, %p1347_p10 }
  0x94   : > { %1357 = shalt.err (!%p1354_p0)
}
  0x95   : > { %s2623_s21 = smov 8   ;;  %s2624_s14 = smov 128  }
  0x96   : > { %s2625_s9 = sld [smem:[#allocation18_spill]]  ;;  %s2626_s0 = sld [smem:[#allocation28_spill]] }
  0x97   : > { %s2627_s18 = sld [smem:[#allocation17_spill]]  ;;  %s2628_s12 = sld [smem:[#allocation16_spill]] }
  0x98   : > { %s2629_s20 = sld [smem:[#allocation27_spill]]  ;;  %p2631_p10 = scmp.lt.s32.totalorder %s1695_s11, 15 }
  0x99   : > { %1123 = dma.hbm_to_vmem [thread:$0]  (!%p1839_p12), %s1835_s1, 2048, %s1830_s27, %s1843_s10, %s2624_s14, %s2624_s14, %s2623_s21  }
  0x9a   : > { %s2683_s11 = smov (!%p2631_p10, %s1695_s11), 15  ;;  %p2632_p3 = scmp.eq.s32.totalorder %s1546_s6, 0 }
  0x9b   : > { %p2633_p13 = scmp.eq.s32.totalorder %s1755_s19, 0  ;;  %s2635_s23 = sld [smem:[#allocation34_spill]] }
  0x9c   : > { %s118_s3 = sadd.s32 1, %s2625_s9  ;;  %p2630_p11 = scmp.lt.s32.totalorder %s2626_s0, 15 }
  0x9d   : > { %p125_p6 = scmp.ne.s32.totalorder %s2625_s9, %s2627_s18  ;;  %p131_p2 = scmp.ne.s32.totalorder %s2627_s18, %s2628_s12 }
  0x9e   : > { %s2681_s0 = smov (!%p2630_p11, %s2626_s0), 15  ;;  %s294_s30 = sand.u32 1, %s2625_s9  }
  0x9f   : > { %s114_s17 = ssub.s32 %s2681_s0, %s2683_s11  ;;  %p127_p7 = por %p125_p6, %p2632_p3 }
  0xa0   : > { %s115_s29 = sor.u32 %s114_s17, %s2629_s20  ;;  %p1891_p9 = por %p131_p2, %p2633_p13 }
  0xa1   : > { %p116_p1 = scmp.eq.s32.totalorder %s115_s29, 0  ;;  %s1075_s1 = sshll.u32 %s294_s30, 4 }
  0xa2   : > { %s2634_s15 = scalar_select %p1891_p9, 1, 0 }
  0xa3   : > { %s1077_s27 = sshll.u32 %s2681_s0, 1  ;;  %s2685_s9 = smov (!%p116_p1, %s2625_s9), %s118_s3 }
  0xa4   : > { %s306_s10 = sadd.s32 %s1077_s27, %s1703_s4  ;;  %s296_s28 = scalar_lea.vmem [#allocation7], %s1075_s1 }
  0xa5   : > { %s1079_s26 = sshll.u32 %s306_s10, 7  ;;  %s309_s18 = sshll.u32 %s296_s28, 4  ;;  %s1904_s18 = int_to_ptr.vmem [resolvable:$true] %s309_s18 }
  0xa6   : > { %s2636_s16 = smov %s2635_s23  ;;  %s1902_s20 = scalar_lea.hbm %s2635_s23, %s1079_s26 }
  0xa7   : > { %p2637_p12 = scmp.lt.s32.totalorder %s1546_s6, 4  ;;  %s1358_s4 = scalar_lea.hbm %s1902_s20, 256 }
  0xa8   : > { %p1359_p8 = scmp.ne.s32.totalorder %s1902_s20, %s1358_s4  ;;  %s1363_s28 = scalar_lea.hbm %s2636_s16, 8192 }
  0xa9   : > { %p1908_p4 = pnand %p2637_p12, %p127_p7  ;;  %p1364_p6 = scmp.lt.u32.totalorder %s1902_s20, %s2636_s16 }
  0xaa   : > { %p1365_p2 = scmp.lt.u32.totalorder %s1363_s28, %s1358_s4  ;;  %p1367_p7 = scmp.lt.u32.totalorder %s1358_s4, %s1902_s20 }
  0xab   : > { %p1360_p0 = pneg %p1908_p4 }
  0xac   : > { %p1366_p3 = por %p1365_p2, %p1364_p6 }
  0xad   : > { %p1361_p11 = pnand %p1360_p0, %p1359_p8 }
  0xae   : > { %p1368_p1 = por %p1367_p7, %p1366_p3 }
  0xaf   : > { %p1362_p10 = pneg %p1361_p11 }
  0xb1   : > { %p1369_p13 = pnand %p1368_p1, %p1362_p10 }
  0xb3   : > { %1372 = shalt.err (!%p1369_p13)
}
  0xb4   : > { %s1373_s3 = scalar_lea.vmem %s1904_s18, 256  ;;  %s1555_s17 = smov [#allocation7]  }
  0xb5   : > { %p1374_p12 = scmp.ne.s32.totalorder %s1904_s18, %s1373_s3  ;;  %s1378_s1 = sshll.u32 %s1555_s17, 4  ;;  %s1379_s1 = int_to_ptr.vmem [resolvable:$false] %s1378_s1 }
  0xb6   : > { %s1380_s27 = scalar_lea.vmem %s1379_s1, 512  ;;  %p1381_p9 = scmp.lt.s32.totalorder %s1904_s18, %s1379_s1 }
  0xb7   : > { %p1376_p8 = pnand %p1374_p12, %p1360_p0  ;;  %p1382_p6 = scmp.lt.s32.totalorder %s1380_s27, %s1373_s3 }
  0xb9   : > { %p1377_p11 = pneg %p1376_p8  ;;  %p1383_p2 = por %p1382_p6, %p1381_p9 }
  0xbb   : > { %p1384_p3 = pnand %p1383_p2, %p1377_p11 }
  0xbd   : > { %1387 = shalt.err (!%p1384_p3)
}
  0xbe   : > { %1129 = dma.hbm_to_vmem [thread:$0]  (!%p1908_p4), %s1902_s20, 256, %s1904_s18, %s1723_s2, %s2624_s14, %s2624_s14, %s2623_s21  }
  0xbf   : > { %p2639_p0 = scmp.ne.s32.totalorder %s2608_s5, 0 }
  0xc0   : > { %s1944_s10 = sand.u32 (!%p2639_p0), 1, %s1522_s25  }
  0xc1   : > { %321 = sbr.rel (%p2639_p0) target bundleno = 341 (0x155), region = 40  ;;  %s1081_s12 = sshll.u32 (!%p2639_p0), %s1944_s10, 7 }
  0xc2   : > { %s324_s11 = scalar_lea.sflag (!%p2639_p0), [#allocation3], %s1944_s10  ;;  %s1950_s0 = scalar_lea.vmem (!%p2639_p0), [#allocation2], %s1081_s12 }
  0xc8   : > { %1473 = dma.done.wait (%p1814_p5), %s324_s11, 2048  }
  0xc9   : > { %1475 = vsyncadd (%p1814_p5), %s324_s11, 4294965248  ;;  %s332_s2 = sand.u32 1, %s1755_s19   ;;  %s334_s5 = sand.u32 1, %s1510_s22  }
  0xca   : > { %s1958_s21 = sshll.u32 %s334_s5, 4  ;;  %s333_s14 = scalar_lea.sflag [#allocation6], %s332_s2 }
  0xcb   : > { %s336_s18 = scalar_lea.vmem [#allocation5], %s1958_s21  ;;  %p2640_p9 = scmp.ne.s32.totalorder %s2607_s8, 0 }
  0xcd   : > { %1477 = dma.done.wait (%p2640_p9), %s333_s14, 256  }
  0xce   : > { %1479 = vsyncadd (%p2640_p9), %s333_s14, 4294967040  ;;  %s2641_s20 = sld [smem:[#allocation17_spill]]  ;;  %p2642_p5 = scmp.ne.s32.totalorder %s2634_s15, 0 }
  0xd4   : > { %s343_s4 = sand.u32 1, %s2641_s20  }
  0xd5   : > { %s1966_s7 = sshll.u32 %s343_s4, 4 }
  0xd6   : > { %s345_s23 = scalar_lea.vmem [#allocation7], %s1966_s7 }
  0xd7   : > { %1481 = dma.done.wait (%p2642_p5), %s333_s14, 256  }
  0xd8   : > { %1483 = vsyncadd (%p2642_p5), %s333_s14, 4294967040  ;;  %p2643_p4 = scmp.eq.s32.totalorder %s1755_s19, 0 }
  0xda   : > { %1485 = dma.done.wait (%p2643_p4), [#allocation9], 192   ;;  %p2644_p10 = pmov %p2643_p4 }
  0xdb   : > { %s2645_s8 = sld [smem:[#allocation21_spill]]  ;;  %v448_v0 = vlaneseq  ;;  %v1984_v3 = vld [vmem:[%s1950_s0] sm:$0xff]  ;;  %v1987_v4 = vld [vmem:[%s1950_s0 + $0x8] sm:$0xff]  ;;  %v1990_v5 = vld [vmem:[%s1950_s0 + $0x10] sm:$0xff]  ;;  %v1556_v8 = vmov 0.0   ;;  %s2646_s28 = sld [smem:[#allocation36_spill]] }
  0xdc   : > { %1487 = vsyncadd (%p2644_p10), [#allocation9], 4294967104  ;;  %v1993_v6 = vld [vmem:[%s1950_s0 + $0x18] sm:$0xff]  ;;  %v429_v14 = vrot.slane %v1984_v3, 7  ;;  %v430_v15 = vrot.slane %v1990_v5, 7  ;;  %v439_v16 = vrot.slane %v1987_v4, 7 }
  0xdd   : > { %v1979_v1 = vshrl.u32 %v448_v0, 7  ;;  %v440_v18 = vrot.slane %v1993_v6, 7  ;;  %v472_v20 = vrot.slane %v1984_v3, 1  ;;  %v512_v21 = vld [vmem:[#allocation8] sm:$0x7]  ;;  %v482_v23 = vrot.slane %v1987_v4, 1 }
  0xde   : > { %v513_v24 = vld [vmem:[#allocation8 + $0x4] sm:$0x7]  ;;  %v514_v25 = vld [vmem:[#allocation8 + $0x8] sm:$0x7]  ;;  %v473_v27 = vrot.slane %v1990_v5, 1  ;;  %v483_v28 = vrot.slane %v1993_v6, 1 }
  0xdf   : > { %vm516_vm0 = vcmp.ge.s32.totalorder %v1979_v1, 1  ;;  %v530_v2 = vsub.s32 0, %v1979_v1  ;;  %vm450_vm1 = vcmp.lt.s32.totalorder %v1979_v1, 1  ;;  %v548_v10 = vsub.s32 2, %v1979_v1  ;;  %s2174_s29 = scalar_lea.vmem [#allocation10], %s1081_s12  ;;  %s2647_s3 = sld [smem:[#allocation22_spill]] }
  0xe0   : > { %v1086_v9 = vsel %vm516_vm0, 1.0, %v1556_v8  ;;  %v573_v11 = vsub.s32 1, %v1979_v1  ;;  %vm491_vm2 = vcmp.lt.s32.totalorder %v1979_v1, 7  ;;  %v462_v33 = vsel %vm450_vm1, %v439_v16, %v429_v14  ;;  %s904_s11 = sshll.u32 %s2174_s29, 4  ;;  %s2648_s5 = sld [smem:[#allocation37_spill]]  ;;  %s2473_s11 = int_to_ptr.vmem [resolvable:$true] %s904_s11 }
  0xe1   : > { %p412_p7 = scmp.gt.s32.totalorder %s2645_s8, 0  ;;  %p420_p1 = scmp.lt.s32.totalorder %s2645_s8, 1  ;;  %v2009_v26 = vrot.slane %v512_v21, %v530_v2  ;;  %v2014_v29 = vrot.slane %v513_v24, %v530_v2  ;;  %v2021_v32 = vrot.slane %v514_v25, %v530_v2  ;;  %v463_v34 = vsel %vm450_vm1, %v440_v18, %v430_v15  ;;  %v2050_v41 = vld [vmem:[%s2646_s28] ss:$0 sm:$0xff] }
  0xe2   : > { %v2033_v35 = vrot.slane %v512_v21, %v573_v11  ;;  %v515_v36 = vadd.s32 8, %v1979_v1  ;;  %v493_v38 = vsel %vm491_vm2, %v472_v20, %v482_v23  ;;  %v2045_v40 = vrot.slane %v512_v21, %v548_v10  ;;  %s1103_s17 = sshll.u32 %s2645_s8, 4  ;;  %s888_s14 = scalar_lea.sflag [#allocation4], %s1944_s10 }
  0xe3   : > { %s1259_s15 = scalar_select %p412_p7, 255, 0  ;;  %v2019_v31 = vmul.f32 %v1086_v9, %v2009_v26  ;;  %v2043_v39 = vmul.f32 %v1086_v9, %v2014_v29  ;;  %v494_v42 = vsel %vm491_vm2, %v473_v27, %v483_v28  ;;  %v2060_v46 = vmul.f32 %v1086_v9, %v2021_v32 }
  0xe4   : > { %v579_v44 = vmul.f32 %v2033_v35, %v1990_v5  ;;  %v2062_v47 = vrot.slane %v513_v24, %v548_v10  ;;  %v2064_v48 = vrot.slane %v514_v25, %v548_v10  ;;  %v2066_v49 = vrot.slane %v513_v24, %v573_v11  ;;  %s1265_s30 = scalar_select %p420_p1, 255, 0 }
  0xe5   : > { %v1995_v7 = vld [vmem:[%s336_s18] sm:%s1259_s15]  ;;  %v1263_v12 = vld [vmem:[%s336_s18 + $0x8] sm:%s1259_s15]  ;;  %v2070_v51 = vmul.f32 %v2019_v31, %v462_v33  ;;  %v611_v52 = vmul.f32 %v2019_v31, %v463_v34  ;;  %v2076_v55 = vmul.f32 %v2045_v40, %v493_v38  ;;  %v643_v56 = vmul.f32 %v2045_v40, %v494_v42  ;;  %s1092_s1 = sshll.u32 %s2647_s3, 5  ;;  %s1388_s18 = scalar_lea.vmem %s2473_s11, 2048 }
  0xe6   : > { %v428_v13 = vrot.slane %v1995_v7, 7  ;;  %v438_v17 = vrot.slane %v1263_v12, 7  ;;  %v471_v19 = vrot.slane %v1995_v7, 1  ;;  %v481_v22 = vrot.slane %v1263_v12, 1  ;;  %s901_s27 = sadd.s32 %s1103_s17, %s1092_s1  ;;  %p1389_p13 = scmp.ne.s32.totalorder %s2473_s11, %s1388_s18 }
  0xe7   : > { %v575_v43 = vmul.f32 %v1995_v7, %v2033_v35  ;;  %v595_v54 = vadd.f32 %v2050_v41, %v579_v44  ;;  %v707_v57 = vmul.f32 %v2043_v39, %v462_v33  ;;  %v675_v59 = vmul.f32 %v2066_v49, %v1984_v3  ;;  %s1093_s12 = sshll.u32 %s901_s27, 7  ;;  %p2649_p12 = scmp.ne.s32.totalorder %s2617_s13, 0 }
  0xe8   : > { %v461_v30 = vsel %vm450_vm1, %v438_v17, %v428_v13  ;;  %v492_v37 = vsel %vm491_vm2, %v471_v19, %v481_v22  ;;  %v2083_v60 = vmul.f32 %v2043_v39, %v463_v34  ;;  %v451_v61 = vsel %vm450_vm1, %v428_v13, %v438_v17  ;;  %s2471_s21 = scalar_lea.hbm %s2648_s5, %s1093_s12  ;;  %s1557_s20 = smov [#allocation10]  }
  0xe9   : > { %v607_v45 = vmul.f32 %v2019_v31, %v461_v30  ;;  %v591_v50 = vadd.f32 %v2050_v41, %v575_v43  ;;  %v639_v53 = vmul.f32 %v2045_v40, %v492_v37  ;;  %v739_v62 = vmul.f32 %v2062_v47, %v493_v38  ;;  %v2139_v43 = vld [vmem:[%s1950_s0 + $0x28] sm:$0xff]  ;;  %p1390_p8 = pnand %p1389_p13, %p2649_p12  ;;  %s1392_s4 = sshll.u32 %s1557_s20, 4  ;;  %s1393_s4 = int_to_ptr.vmem [resolvable:$false] %s1392_s4 }
  0xea   : > { %v2089_v63 = vmul.f32 %v2062_v47, %v494_v42  ;;  %v2091_v0 = vrot.slane %v514_v25, %v573_v11  ;;  %v807_v2 = vmul.f32 %v2060_v46, %v463_v34  ;;  %v839_v9 = vmul.f32 %v2064_v48, %v494_v42  ;;  %v2136_v42 = vld [vmem:[%s1950_s0 + $0x20] sm:$0xff]  ;;  %s1394_s7 = scalar_lea.vmem %s1393_s4, 4096  ;;  %p1395_p6 = scmp.lt.s32.totalorder %s2473_s11, %s1393_s4 }
  0xeb   : > { %v623_v58 = vadd.f32 %v607_v45, %v591_v50  ;;  %vm523_vm3 = vcmp.le.s32.totalorder %v515_v36, 14  ;;  %v576_v10 = vmul.f32 %v1263_v12, %v2033_v35  ;;  %v627_v21 = vadd.f32 %v611_v52, %v595_v54  ;;  %p1391_p11 = pneg %p1390_p8  ;;  %p1396_p2 = scmp.lt.s32.totalorder %s1394_s7, %s1388_s18 }
  0xec   : > { %v502_v24 = vsel %vm491_vm2, %v481_v22, %v471_v19  ;;  %v1087_v13 = vsel %vm523_vm3, 1.0, %v1556_v8  ;;  %v608_v17 = vmul.f32 %v2009_v26, %v451_v61  ;;  %v452_v11 = vsel %vm450_vm1, %v429_v14, %v439_v16 }
  0xed   : > { %v655_v7 = vadd.f32 %v639_v53, %v623_v58  ;;  %v2105_v25 = vmul.f32 %v1087_v13, %v2045_v40  ;;  %v580_v12 = vmul.f32 %v2033_v35, %v1993_v6  ;;  %v775_v19 = vmul.f32 %v2091_v0, %v1990_v5  ;;  %p1397_p3 = por %p1396_p2, %p1395_p6 }
  0xee   : > { %v453_v8 = vsel %vm450_vm1, %v430_v15, %v440_v18  ;;  %v2118_v22 = vmul.f32 %v1087_v13, %v2062_v47  ;;  %v592_v14 = vadd.f32 %v2050_v41, %v576_v10  ;;  %v503_v33 = vsel %vm491_vm2, %v482_v23, %v472_v20 }
  0xef   : > { %v691_v30 = vadd.f32 %v675_v59, %v655_v7  ;;  %v504_v34 = vsel %vm491_vm2, %v483_v28, %v473_v27  ;;  %v640_v36 = vmul.f32 %v2105_v25, %v502_v24  ;;  %v2128_v37 = vadd.f32 %v643_v56, %v627_v21  ;;  %p1398_p0 = pnand %p1397_p3, %p1391_p11 }
  0xf0   : > { %v2131_v15 = vmul.f32 %v2009_v26, %v452_v11  ;;  %v624_v18 = vadd.f32 %v608_v17, %v592_v14  ;;  %v676_v38 = vmul.f32 %v2066_v49, %v1987_v4  ;;  %v2142_v20 = vmul.f32 %v1087_v13, %v2064_v48 }
  0xf1   : > { %v723_v16 = vadd.f32 %v707_v57, %v691_v30  ;;  %v596_v23 = vadd.f32 %v2050_v41, %v580_v12  ;;  %v612_v27 = vmul.f32 %v2009_v26, %v453_v8  ;;  %v644_v28 = vmul.f32 %v2105_v25, %v504_v34 }
  0xf2   : > { %v656_v45 = vadd.f32 %v640_v36, %v624_v18  ;;  %v708_v50 = vmul.f32 %v2014_v29, %v452_v11  ;;  %v740_v52 = vmul.f32 %v2118_v22, %v503_v33  ;;  %v431_v54 = vrot.slane %v2136_v42, 7 }
  0xf3   : > { %v755_v44 = vadd.f32 %v739_v62, %v723_v16  ;;  %v441_v56 = vrot.slane %v2139_v43, 7  ;;  %v474_v57 = vrot.slane %v2136_v42, 1  ;;  %v484_v59 = vrot.slane %v2139_v43, 1 }
  0xf4   : > { %v692_v58 = vadd.f32 %v676_v38, %v656_v45  ;;  %v577_v61 = vmul.f32 %v2033_v35, %v1984_v3  ;;  %v581_v62 = vmul.f32 %v2033_v35, %v2136_v42  ;;  %v628_v10 = vadd.f32 %v612_v27, %v596_v23 }
  0xf5   : > { %v791_v53 = vadd.f32 %v775_v19, %v755_v44  ;;  %v776_v21 = vmul.f32 %v2091_v0, %v1993_v6  ;;  %v464_v24 = vsel %vm450_vm1, %v441_v56, %v431_v54  ;;  %v495_v17 = vsel %vm491_vm2, %v474_v57, %v484_v59 }
  0xf6   : > { %v724_v13 = vadd.f32 %v708_v50, %v692_v58  ;;  %v593_v30 = vadd.f32 %v2050_v41, %v577_v61  ;;  %v597_v3 = vadd.f32 %v2050_v41, %v581_v62  ;;  %v642_v12 = vmul.f32 %v2105_v25, %v503_v33  ;;  %v2195_v58 = vld [vmem:[%s1950_s0 + $0x30] sm:$0xff] }
  0xf7   : > { %v823_v7 = vadd.f32 %v807_v2, %v791_v53  ;;  %v710_v2 = vmul.f32 %v2014_v29, %v453_v8  ;;  %v613_v19 = vmul.f32 %v2019_v31, %v464_v24  ;;  %v808_v16 = vmul.f32 %v2021_v32, %v453_v8 }
  0xf8   : > { %v756_v14 = vadd.f32 %v740_v52, %v724_v13  ;;  %v625_v36 = vadd.f32 %v2070_v51, %v593_v30  ;;  %v677_v18 = vmul.f32 %v2066_v49, %v1990_v5  ;;  %v742_v33 = vmul.f32 %v2118_v22, %v504_v34 }
  0xf9   : > { %v855_v11 = vadd.f32 %v839_v9, %v823_v7  ;;  %v2177_v9 = vadd.f32 %v644_v28, %v628_v10  ;;  %v629_v38 = vadd.f32 %v613_v19, %v597_v3  ;;  %v645_v44 = vmul.f32 %v2045_v40, %v495_v17 }
  0xfa   : > { %v792_v8 = vadd.f32 %v776_v21, %v756_v14  ;;  %v840_v51 = vmul.f32 %v2142_v20, %v504_v34  ;;  %v657_v23 = vadd.f32 %v2076_v55, %v625_v36  ;;  %v578_v5 = vmul.f32 %v2033_v35, %v1987_v4  ;;  %v2198_v4 = vld [vmem:[%s1950_s0 + $0x38] sm:$0xff] }
  0xfb   : > { %871 = vst [vmem:[%s2174_s29] sm:$0xff] %v855_v11  ;;  %v711_v27 = vmul.f32 %v2043_v39, %v464_v24  ;;  %v743_v28 = vmul.f32 %v2062_v47, %v495_v17  ;;  %v777_v45 = vmul.f32 %v2091_v0, %v2136_v42  ;;  %v582_v50 = vmul.f32 %v2033_v35, %v2139_v43 }
  0xfc   : > { %v824_v52 = vadd.f32 %v808_v16, %v792_v8  ;;  %v693_v53 = vadd.f32 %v677_v18, %v657_v23  ;;  %v454_v34 = vsel %vm450_vm1, %v431_v54, %v441_v56  ;;  %v594_v55 = vadd.f32 %v2050_v41, %v578_v5 }
  0xfd   : > { %v2200_v61 = vadd.f32 %v645_v44, %v629_v38  ;;  %v809_v62 = vmul.f32 %v2060_v46, %v464_v24  ;;  %v841_v7 = vmul.f32 %v2064_v48, %v495_v17  ;;  %v505_v10 = vsel %vm491_vm2, %v484_v59, %v474_v57 }
  0xfe   : > { %v856_v21 = vadd.f32 %v840_v51, %v824_v52  ;;  %v725_v13 = vadd.f32 %v2083_v60, %v693_v53  ;;  %v626_v54 = vadd.f32 %v2131_v15, %v594_v55  ;;  %v678_v56 = vmul.f32 %v2066_v49, %v1993_v6 }
  0xff   : > { %v598_v30 = vadd.f32 %v2050_v41, %v582_v50  ;;  %v614_v3 = vmul.f32 %v2009_v26, %v454_v34  ;;  %v432_v11 = vrot.slane %v2195_v58, 7  ;;  %v442_v24 = vrot.slane %v2198_v4, 7 }
 0x100   : > { %872 = vst [vmem:[%s2174_s29 + $0x8] sm:$0xff] %v856_v21  ;;  %v757_v17 = vadd.f32 %v2089_v63, %v725_v13  ;;  %v646_v57 = vmul.f32 %v2105_v25, %v505_v10  ;;  %v658_v59 = vadd.f32 %v642_v12, %v626_v54  ;;  %v712_v60 = vmul.f32 %v2014_v29, %v454_v34 }
 0x101   : > { %v744_v15 = vmul.f32 %v2118_v22, %v505_v10  ;;  %v475_v6 = vrot.slane %v2195_v58, 1  ;;  %v583_v19 = vmul.f32 %v2033_v35, %v2195_v58  ;;  %v679_v14 = vmul.f32 %v2066_v49, %v2136_v42 }
 0x102   : > { %v793_v16 = vadd.f32 %v777_v45, %v757_v17  ;;  %v694_v36 = vadd.f32 %v678_v56, %v658_v59  ;;  %v465_v63 = vsel %vm450_vm1, %v442_v24, %v432_v11  ;;  %v485_v18 = vrot.slane %v2198_v4, 1  ;;  %v2251_v56 = vld [vmem:[%s1950_s0 + $0x40] sm:$0xff] }
 0x103   : > { %v630_v12 = vadd.f32 %v614_v3, %v598_v30  ;;  %v778_v38 = vmul.f32 %v2091_v0, %v2139_v43  ;;  %v810_v44 = vmul.f32 %v2021_v32, %v454_v34  ;;  %v695_v8 = vadd.f32 %v679_v14, %v2128_v37  ;;  %v2254_v30 = vld [vmem:[%s1950_s0 + $0x48] sm:$0xff] }
 0x104   : > { %v825_v51 = vadd.f32 %v809_v62, %v793_v16  ;;  %v726_v23 = vadd.f32 %v710_v2, %v694_v36  ;;  %v842_v42 = vmul.f32 %v2142_v20, %v505_v10  ;;  %v779_v5 = vmul.f32 %v2091_v0, %v2195_v58 }
 0x105   : > { %v599_v45 = vadd.f32 %v2050_v41, %v583_v19  ;;  %v615_v50 = vmul.f32 %v2019_v31, %v465_v63  ;;  %v727_v52 = vadd.f32 %v711_v27, %v695_v8  ;;  %v455_v53 = vsel %vm450_vm1, %v432_v11, %v442_v24 }
 0x106   : > { %v857_v34 = vadd.f32 %v841_v7, %v825_v51  ;;  %v758_v37 = vadd.f32 %v742_v33, %v726_v23  ;;  %v496_v2 = vsel %vm491_vm2, %v475_v6, %v485_v18  ;;  %v584_v55 = vmul.f32 %v2033_v35, %v2198_v4 }
 0x107   : > { %v759_v62 = vadd.f32 %v743_v28, %v727_v52  ;;  %v811_v10 = vmul.f32 %v2060_v46, %v465_v63  ;;  %v506_v21 = vsel %vm491_vm2, %v485_v18, %v475_v6  ;;  %v616_v27 = vmul.f32 %v2009_v26, %v455_v53 }
 0x108   : > { %873 = vst [vmem:[%s2174_s29 + $0x10] sm:$0xff] %v857_v34  ;;  %v662_v13 = vadd.f32 %v646_v57, %v630_v12  ;;  %v794_v54 = vadd.f32 %v778_v38, %v758_v37  ;;  %v600_v7 = vadd.f32 %v2050_v41, %v584_v55  ;;  %v680_v33 = vmul.f32 %v2066_v49, %v2139_v43 }
 0x109   : > { %v631_v28 = vadd.f32 %v615_v50, %v599_v45  ;;  %v647_v3 = vmul.f32 %v2045_v40, %v496_v2  ;;  %v795_v11 = vadd.f32 %v779_v5, %v759_v62  ;;  %v843_v24 = vmul.f32 %v2064_v48, %v496_v2 }
 0x10a   : > { %v826_v17 = vadd.f32 %v810_v44, %v794_v54  ;;  %v648_v57 = vmul.f32 %v2105_v25, %v506_v21  ;;  %v696_v59 = vadd.f32 %v680_v33, %v2177_v9  ;;  %v780_v6 = vmul.f32 %v2091_v0, %v2198_v4 }
 0x10b   : > { %v827_v43 = vadd.f32 %v811_v10, %v795_v11  ;;  %v632_v19 = vadd.f32 %v616_v27, %v600_v7  ;;  %v433_v14 = vrot.slane %v2251_v56, 7  ;;  %v443_v16 = vrot.slane %v2254_v30, 7  ;;  %v2302_v11 = vld [vmem:[%s1950_s0 + $0x58] sm:$0xff] }
 0x10c   : > { %v858_v36 = vadd.f32 %v842_v42, %v826_v17  ;;  %v728_v18 = vadd.f32 %v712_v60, %v696_v59  ;;  %v476_v12 = vrot.slane %v2251_v56, 1  ;;  %v486_v38 = vrot.slane %v2254_v30, 1 }
 0x10d   : > { %v713_v44 = vmul.f32 %v2043_v39, %v465_v63  ;;  %v745_v9 = vmul.f32 %v2062_v47, %v496_v2  ;;  %v859_v8 = vadd.f32 %v843_v24, %v827_v43  ;;  %v681_v51 = vmul.f32 %v2066_v49, %v2195_v58 }
 0x10e   : > { %874 = vst [vmem:[%s2174_s29 + $0x18] sm:$0xff] %v858_v36  ;;  %v760_v23 = vadd.f32 %v744_v15, %v728_v18  ;;  %v812_v5 = vmul.f32 %v2021_v32, %v455_v53  ;;  %v466_v42 = vsel %vm450_vm1, %v443_v16, %v433_v14  ;;  %v585_v60 = vmul.f32 %v2033_v35, %v2251_v56 }
 0x10f   : > { %v663_v45 = vadd.f32 %v647_v3, %v631_v28  ;;  %875 = vst [vmem:[%s2174_s29 + $0x20] sm:$0xff] %v859_v8  ;;  %v714_v63 = vmul.f32 %v2014_v29, %v455_v53  ;;  %v746_v50 = vmul.f32 %v2118_v22, %v506_v21  ;;  %v697_v52 = vadd.f32 %v681_v51, %v2200_v61  ;;  %v2299_v3 = vld [vmem:[%s1950_s0 + $0x50] sm:$0xff] }
 0x110   : > { %v2280_v34 = vadd.f32 %v648_v57, %v632_v19  ;;  %v796_v58 = vadd.f32 %v780_v6, %v760_v23  ;;  %v844_v15 = vmul.f32 %v2142_v20, %v506_v21  ;;  %v497_v37 = vsel %vm491_vm2, %v476_v12, %v486_v38 }
 0x111   : > { %v617_v2 = vmul.f32 %v2019_v31, %v466_v42  ;;  %v715_v55 = vmul.f32 %v2043_v39, %v466_v42  ;;  %v729_v62 = vadd.f32 %v713_v44, %v697_v52  ;;  %v781_v53 = vmul.f32 %v2091_v0, %v2251_v56 }
 0x112   : > { %v828_v10 = vadd.f32 %v812_v5, %v796_v58  ;;  %v601_v61 = vadd.f32 %v2050_v41, %v585_v60  ;;  %v456_v27 = vsel %vm450_vm1, %v433_v14, %v443_v16  ;;  %v586_v21 = vmul.f32 %v2033_v35, %v2254_v30 }
 0x113   : > { %v649_v54 = vmul.f32 %v2045_v40, %v497_v37  ;;  %v761_v7 = vadd.f32 %v745_v9, %v729_v62  ;;  %v813_v33 = vmul.f32 %v2060_v46, %v466_v42  ;;  %v682_v28 = vmul.f32 %v2066_v49, %v2198_v4 }
 0x114   : > { %v860_v24 = vadd.f32 %v844_v15, %v828_v10  ;;  %v747_v17 = vmul.f32 %v2062_v47, %v497_v37  ;;  %v845_v57 = vmul.f32 %v2064_v48, %v497_v37  ;;  %v507_v59 = vsel %vm491_vm2, %v486_v38, %v476_v12 }
 0x115   : > { %v797_v6 = vadd.f32 %v781_v53, %v761_v7  ;;  %v602_v43 = vadd.f32 %v2050_v41, %v586_v21  ;;  %v618_v19 = vmul.f32 %v2009_v26, %v456_v27  ;;  %v698_v14 = vadd.f32 %v682_v28, %v662_v13 }
 0x116   : > { %876 = vst [vmem:[%s2174_s29 + $0x28] sm:$0xff] %v860_v24  ;;  %v633_v4 = vadd.f32 %v617_v2, %v601_v61  ;;  %v782_v16 = vmul.f32 %v2091_v0, %v2254_v30  ;;  %v434_v36 = vrot.slane %v2299_v3, 7  ;;  %v444_v18 = vrot.slane %v2302_v11, 7 }
 0x117   : > { %v829_v44 = vadd.f32 %v813_v33, %v797_v6  ;;  %v730_v9 = vadd.f32 %v714_v63, %v698_v14  ;;  %v477_v12 = vrot.slane %v2299_v3, 1  ;;  %v487_v38 = vrot.slane %v2302_v11, 1 }
 0x118   : > { %v650_v8 = vmul.f32 %v2105_v25, %v507_v59  ;;  %v814_v13 = vmul.f32 %v2021_v32, %v456_v27  ;;  %v587_v51 = vmul.f32 %v2033_v35, %v2299_v3  ;;  %v683_v23 = vmul.f32 %v2066_v49, %v2251_v56 }
 0x119   : > { %v861_v5 = vadd.f32 %v845_v57, %v829_v44  ;;  %v634_v42 = vadd.f32 %v618_v19, %v602_v43  ;;  %v762_v60 = vadd.f32 %v746_v50, %v730_v9  ;;  %v467_v63 = vsel %vm450_vm1, %v444_v18, %v434_v36  ;;  %v2348_v57 = vld [vmem:[%s1950_s0 + $0x60] sm:$0xff] }
 0x11a   : > { %v665_v52 = vadd.f32 %v649_v54, %v633_v4  ;;  %v716_v58 = vmul.f32 %v2014_v29, %v456_v27  ;;  %v748_v15 = vmul.f32 %v2118_v22, %v507_v59  ;;  %v699_v37 = vadd.f32 %v683_v23, %v663_v45 }
 0x11b   : > { %877 = vst [vmem:[%s2174_s29 + $0x30] sm:$0xff] %v861_v5  ;;  %v798_v2 = vadd.f32 %v782_v16, %v762_v60  ;;  %v846_v62 = vmul.f32 %v2142_v20, %v507_v59  ;;  %v498_v56 = vsel %vm491_vm2, %v477_v12, %v487_v38  ;;  %v783_v50 = vmul.f32 %v2091_v0, %v2299_v3  ;;  %v2351_v59 = vld [vmem:[%s1950_s0 + $0x68] sm:$0xff] }
 0x11c   : > { %v603_v53 = vadd.f32 %v2050_v41, %v587_v51  ;;  %v619_v10 = vmul.f32 %v2019_v31, %v467_v63  ;;  %v731_v61 = vadd.f32 %v715_v55, %v699_v37  ;;  %v457_v45 = vsel %vm450_vm1, %v434_v36, %v444_v18 }
 0x11d   : > { %v2337_v27 = vadd.f32 %v650_v8, %v634_v42  ;;  %v830_v21 = vadd.f32 %v814_v13, %v798_v2  ;;  %v508_v54 = vsel %vm491_vm2, %v487_v38, %v477_v12  ;;  %v588_v7 = vmul.f32 %v2033_v35, %v2302_v11 }
 0x11e   : > { %v763_v33 = vadd.f32 %v747_v17, %v731_v61  ;;  %v815_v28 = vmul.f32 %v2060_v46, %v467_v63  ;;  %v620_v24 = vmul.f32 %v2009_v26, %v457_v45  ;;  %v684_v55 = vmul.f32 %v2066_v49, %v2254_v30 }
 0x11f   : > { %v862_v6 = vadd.f32 %v846_v62, %v830_v21  ;;  %v651_v43 = vmul.f32 %v2045_v40, %v498_v56  ;;  %v847_v19 = vmul.f32 %v2064_v48, %v498_v56  ;;  %v604_v14 = vadd.f32 %v2050_v41, %v588_v7 }
 0x120   : > { %v635_v4 = vadd.f32 %v619_v10, %v603_v53  ;;  %v799_v17 = vadd.f32 %v783_v50, %v763_v33  ;;  %v652_v16 = vmul.f32 %v2105_v25, %v508_v54  ;;  %v700_v36 = vadd.f32 %v684_v55, %v2280_v34 }
 0x121   : > { %878 = vst [vmem:[%s2174_s29 + $0x38] sm:$0xff] %v862_v6  ;;  %v784_v30 = vmul.f32 %v2091_v0, %v2302_v11  ;;  %v435_v18 = vrot.slane %v2348_v57, 7  ;;  %v445_v44 = vrot.slane %v2351_v59, 7  ;;  %v478_v9 = vrot.slane %v2348_v57, 1 }
 0x122   : > { %v831_v12 = vadd.f32 %v815_v28, %v799_v17  ;;  %v636_v38 = vadd.f32 %v620_v24, %v604_v14  ;;  %v732_v8 = vadd.f32 %v716_v58, %v700_v36  ;;  %v488_v13 = vrot.slane %v2351_v59, 1 }
 0x123   : > { %v717_v51 = vmul.f32 %v2043_v39, %v467_v63  ;;  %v749_v34 = vmul.f32 %v2062_v47, %v498_v56  ;;  %v589_v23 = vmul.f32 %v2033_v35, %v2348_v57  ;;  %v685_v5 = vmul.f32 %v2066_v49, %v2299_v3 }
 0x124   : > { %v667_v42 = vadd.f32 %v651_v43, %v635_v4  ;;  %v863_v60 = vadd.f32 %v847_v19, %v831_v12  ;;  %v764_v37 = vadd.f32 %v748_v15, %v732_v8  ;;  %v816_v2 = vmul.f32 %v2021_v32, %v457_v45  ;;  %v410_v43 = vld [vmem:[%s1950_s0 + $0x70] sm:$0xff]  ;;  %v2396_v19 = vld [vmem:[%s1950_s0 + $0x78] sm:$0xff] }
 0x125   : > { %v718_v62 = vmul.f32 %v2014_v29, %v457_v45  ;;  %v468_v58 = vsel %vm450_vm1, %v445_v44, %v435_v18  ;;  %v499_v63 = vsel %vm491_vm2, %v478_v9, %v488_v13  ;;  %v701_v56 = vadd.f32 %v685_v5, %v665_v52 }
 0x126   : > { %879 = vst [vmem:[%s2174_s29 + $0x40] sm:$0xff] %v863_v60  ;;  %v668_v50 = vadd.f32 %v652_v16, %v636_v38  ;;  %v750_v53 = vmul.f32 %v2118_v22, %v508_v54  ;;  %v800_v3 = vadd.f32 %v784_v30, %v764_v37  ;;  %v848_v15 = vmul.f32 %v2142_v20, %v508_v54 }
 0x127   : > { %v605_v10 = vadd.f32 %v2050_v41, %v589_v23  ;;  %v733_v61 = vadd.f32 %v717_v51, %v701_v56  ;;  %v785_v45 = vmul.f32 %v2091_v0, %v2348_v57  ;;  %v458_v21 = vsel %vm450_vm1, %v435_v18, %v445_v44  ;;  %v1266_v56 = vld [vmem:[%s345_s23] sm:%s1265_s30] }
 0x128   : > { %v832_v7 = vadd.f32 %v816_v2, %v800_v3  ;;  %v621_v52 = vmul.f32 %v2019_v31, %v468_v58  ;;  %v653_v33 = vmul.f32 %v2045_v40, %v499_v63  ;;  %v590_v28 = vmul.f32 %v2033_v35, %v2351_v59 }
 0x129   : > { %v765_v24 = vadd.f32 %v749_v34, %v733_v61  ;;  %v817_v54 = vmul.f32 %v2060_v46, %v468_v58  ;;  %v509_v55 = vsel %vm491_vm2, %v488_v13, %v478_v9  ;;  %v686_v6 = vmul.f32 %v2066_v49, %v2302_v11 }
 0x12a   : > { %v864_v31 = vadd.f32 %v848_v15, %v832_v7  ;;  %v719_v40 = vmul.f32 %v2043_v39, %v468_v58  ;;  %v606_v14 = vadd.f32 %v2050_v41, %v590_v28  ;;  %v622_v35 = vmul.f32 %v2009_v26, %v458_v21 }
 0x12b   : > { %v751_v4 = vmul.f32 %v2062_v47, %v499_v63  ;;  %v801_v17 = vadd.f32 %v785_v45, %v765_v24  ;;  %v849_v16 = vmul.f32 %v2064_v48, %v499_v63  ;;  %v702_v36 = vadd.f32 %v686_v6, %v2337_v27 }
 0x12c   : > { %880 = vst [vmem:[%s2174_s29 + $0x48] sm:$0xff] %v864_v31  ;;  %v637_v11 = vadd.f32 %v621_v52, %v605_v10  ;;  %v654_v30 = vmul.f32 %v2105_v25, %v509_v55  ;;  %v436_v18 = vrot.slane %v410_v43, 7  ;;  %v446_v44 = vrot.slane %v2396_v19, 7 }
 0x12d   : > { %v833_v9 = vadd.f32 %v817_v54, %v801_v17  ;;  %v734_v41 = vadd.f32 %v718_v62, %v702_v36  ;;  %v786_v26 = vmul.f32 %v2091_v0, %v2351_v59  ;;  %v687_v12 = vmul.f32 %v2066_v49, %v2348_v57 }
 0x12e   : > { %v638_v38 = vadd.f32 %v622_v35, %v606_v14  ;;  %v818_v27 = vmul.f32 %v2021_v32, %v458_v21  ;;  %v479_v8 = vrot.slane %v410_v43, 1  ;;  %v489_v25 = vrot.slane %v2396_v19, 1 }
 0x12f   : > { %v865_v13 = vadd.f32 %v849_v16, %v833_v9  ;;  %v766_v51 = vadd.f32 %v750_v53, %v734_v41  ;;  %v469_v34 = vsel %vm450_vm1, %v446_v44, %v436_v18  ;;  %v703_v23 = vadd.f32 %v687_v12, %v667_v42  ;;  %v1269_v53 = vld [vmem:[%s345_s23 + $0x8] sm:%s1265_s30] }
 0x130   : > { %v669_v5 = vadd.f32 %v653_v33, %v637_v11  ;;  %v720_v60 = vmul.f32 %v2014_v29, %v458_v21  ;;  %v752_v37 = vmul.f32 %v2118_v22, %v509_v55  ;;  %v850_v57 = vmul.f32 %v2142_v20, %v509_v55 }
 0x131   : > { %881 = vst [vmem:[%s2174_s29 + $0x50] sm:$0xff] %v865_v13  ;;  %v802_v2 = vadd.f32 %v786_v26, %v766_v51  ;;  %v735_v62 = vadd.f32 %v719_v40, %v703_v23  ;;  %v787_v58 = vmul.f32 %v2091_v0, %v410_v43  ;;  %v688_v63 = vmul.f32 %v2066_v49, %v2351_v59 }
 0x132   : > { %v670_v42 = vadd.f32 %v654_v30, %v638_v38  ;;  %v500_v3 = vsel %vm491_vm2, %v479_v8, %v489_v25  ;;  %v721_v15 = vmul.f32 %v2043_v39, %v469_v34  ;;  %v459_v10 = vsel %vm450_vm1, %v436_v18, %v446_v44 }
 0x133   : > { %v834_v61 = vadd.f32 %v818_v27, %v802_v2  ;;  %v767_v45 = vadd.f32 %v751_v4, %v735_v62  ;;  %v819_v21 = vmul.f32 %v2060_v46, %v469_v34  ;;  %v704_v7 = vadd.f32 %v688_v63, %v668_v50 }
 0x134   : > { %v851_v59 = vmul.f32 %v2064_v48, %v500_v3  ;;  %v788_v52 = vmul.f32 %v2091_v0, %v2396_v19  ;;  %v437_v33 = vrot.slane %v1266_v56, 7  ;;  %v447_v28 = vrot.slane %v1269_v53, 7 }
 0x135   : > { %v866_v24 = vadd.f32 %v850_v57, %v834_v61  ;;  %v803_v54 = vadd.f32 %v787_v58, %v767_v45  ;;  %v736_v55 = vadd.f32 %v720_v60, %v704_v7  ;;  %v689_v39 = vmul.f32 %v2066_v49, %v410_v43 }
 0x136   : > { %v753_v6 = vmul.f32 %v2062_v47, %v500_v3  ;;  %v510_v31 = vsel %vm491_vm2, %v489_v25, %v479_v8  ;;  %v480_v40 = vrot.slane %v1266_v56, 1  ;;  %v490_v14 = vrot.slane %v1269_v53, 1 }
 0x137   : > { %882 = vst [vmem:[%s2174_s29 + $0x58] sm:$0xff] %v866_v24  ;;  %v835_v50 = vadd.f32 %v819_v21, %v803_v54  ;;  %v768_v35 = vadd.f32 %v752_v37, %v736_v55  ;;  %v820_v4 = vmul.f32 %v2021_v32, %v459_v10  ;;  %v705_v17 = vadd.f32 %v689_v39, %v669_v5 }
 0x138   : > { %v722_v16 = vmul.f32 %v2014_v29, %v459_v10  ;;  %v852_v43 = vmul.f32 %v2142_v20, %v510_v31  ;;  %v470_v47 = vsel %vm450_vm1, %v447_v28, %v437_v33  ;;  %v690_v36 = vmul.f32 %v2066_v49, %v2396_v19 }
 0x139   : > { %v867_v11 = vadd.f32 %v851_v59, %v835_v50  ;;  %v804_v30 = vadd.f32 %v788_v52, %v768_v35  ;;  %v737_v18 = vadd.f32 %v721_v15, %v705_v17  ;;  %v789_v44 = vmul.f32 %v1266_v56, %v2091_v0 }
 0x13a   : > { %v754_v9 = vmul.f32 %v2118_v22, %v510_v31  ;;  %v501_v41 = vsel %vm491_vm2, %v480_v40, %v490_v14  ;;  %v706_v26 = vadd.f32 %v690_v36, %v670_v42  ;;  %v821_v38 = vmul.f32 %v2060_v46, %v470_v47 }
 0x13b   : > { %883 = vst [vmem:[%s2174_s29 + $0x60] sm:$0xff] %v867_v11  ;;  %v836_v29 = vadd.f32 %v820_v4, %v804_v30  ;;  %v769_v12 = vadd.f32 %v753_v6, %v737_v18  ;;  %v460_v49 = vsel %vm450_vm1, %v437_v33, %v447_v28  ;;  %v790_v27 = vmul.f32 %v1269_v53, %v2091_v0 }
 0x13c   : > { %v738_v19 = vadd.f32 %v722_v16, %v706_v26  ;;  %v853_v25 = vmul.f32 %v2064_v48, %v501_v41  ;;  %v511_v13 = vsel %vm491_vm2, %v490_v14, %v480_v40  ;;  %v822_v46 = vmul.f32 %v2021_v32, %v460_v49 }
 0x13d   : > { %v868_v22 = vadd.f32 %v852_v43, %v836_v29  ;;  %v805_v8 = vadd.f32 %v789_v44, %v769_v12  ;;  %v854_v0 = vmul.f32 %v2142_v20, %v511_v13 }
 0x13e   : > { %v770_v51 = vadd.f32 %v754_v9, %v738_v19 }
 0x13f   : > { %884 = vst [vmem:[%s2174_s29 + $0x68] sm:$0xff] %v868_v22  ;;  %v837_v34 = vadd.f32 %v821_v38, %v805_v8 }
 0x140   : > { %v806_v23 = vadd.f32 %v790_v27, %v770_v51 }
 0x141   : > { %v869_v5 = vadd.f32 %v853_v25, %v837_v34 }
 0x142   : > { %v838_v60 = vadd.f32 %v822_v46, %v806_v23 }
 0x143   : > { %885 = vst [vmem:[%s2174_s29 + $0x70] sm:$0xff] %v869_v5 }
 0x144   : > { %v870_v1 = vadd.f32 %v854_v0, %v838_v60 }
 0x146   : > { %886 = vst [vmem:[%s2174_s29 + $0x78] sm:$0xff] %v870_v1 }
 0x147   : > { %1401 = shalt.err (!%p1398_p0)
}
 0x148   : > { %s1402_s23 = scalar_lea.hbm %s2471_s21, 2048  ;;  %s1406_s19 = scalar_lea.hbm %s2648_s5, 8192 }
 0x149   : > { %p1403_p9 = scmp.ne.s32.totalorder %s2471_s21, %s1402_s23  ;;  %p1407_p10 = scmp.lt.u32.totalorder %s2471_s21, %s2648_s5 }
 0x14a   : > { %p1408_p7 = scmp.lt.u32.totalorder %s1406_s19, %s1402_s23  ;;  %p1410_p13 = scmp.lt.u32.totalorder %s1402_s23, %s2471_s21 }
 0x14b   : > { %p1404_p5 = pnand %p1403_p9, %p2649_p12 }
 0x14c   : > { %p1409_p1 = por %p1408_p7, %p1407_p10 }
 0x14d   : > { %p1405_p4 = pneg %p1404_p5 }
 0x14e   : > { %p1411_p8 = por %p1410_p13, %p1409_p1 }
 0x150   : > { %p1412_p11 = pnand %p1411_p8, %p1405_p4 }
 0x152   : > { %1415 = shalt.err (!%p1412_p11)
}
 0x153   : > { %s1558_s29 = smov 128   ;;  %s1559_s30 = smov 8  }
 0x154   : > { %1114 = dma.vmem_to_hbm [thread:$0]  (%p2649_p12), %s2473_s11, 2048, %s2471_s21, %s888_s14, %s1558_s29, %s1558_s29, %s1559_s30  }
 0x155 PF: > { %s2650_s3 = sld [smem:[#allocation31_spill]]  ;;  %p1137_p6 = scmp.ge.s32.totalorder %s1546_s6, 2 }
 0x156   : > { %s919_s17 = sand.u32 1, %s1518_s24  }
 0x157   : > { %s920_s1 = scalar_lea.sflag [#allocation4], %s919_s17 }
 0x15b   : > { %p2651_p2 = scmp.ne.s32.totalorder %s2650_s3, 0 }
 0x15d   : > { %p1131_p3 = pnand %p1137_p6, %p2651_p2 }
 0x15f   : > { %1489 = dma.done.wait (!%p1131_p3), %s920_s1, 2048  }
 0x160   : > { %1491 = vsyncadd (!%p1131_p3), %s920_s1, 4294965248  ;;  %s25_s6 = sadd.s32 1, %s1546_s6   ;;  %s2653_s18 = sld [smem:[#allocation17_spill]] }
 0x161   : > { %p2505_p0 = scmp.ge.s32.totalorder %s25_s6, 6   ;;  %s2654_s19 = sld [smem:[#allocation18_spill]] }
 0x162   : > { %s2655_s13 = sld [smem:[#allocation19_spill]]  ;;  %s2656_s23 = sld [smem:[#allocation29_spill]] }
 0x163   : > { %s2657_s10 = sld [smem:[#allocation20_spill]]  ;;  %s2658_s26 = sld [smem:[#allocation30_spill]] }
 0x164   : > { %s2659_s12 = sld [smem:[#allocation23_spill]]  ;;  %s2660_s28 = sld [smem:[#allocation24_spill]] }
 0x165   : > { %s2661_s29 = sld [smem:[#allocation25_spill]]  ;;  %s2662_s30 = sld [smem:[#allocation26_spill]] }
 0x166   : > { %s2664_s20 = smov %s2685_s9  ;;  %s2665_s21 = smov %s1510_s22 }
 0x167   : > { %s2667_s24 = smov %s1522_s25  ;;  %24 = sbr.rel (!%p2505_p0) target bundleno = 20 (0x14), region = 113 }
 0x168   : > { %s2666_s22 = smov %s2655_s13 }
 0x169   : > { %s2668_s25 = smov %s2657_s10 }
 0x16a   : > { %s2669_s27 = smov %s2659_s12 }
 0x16e   :  { %925 = vsyncpa [#allocation3], 1 }
 0x16f   :  { %927 = vsyncpa [#allocation3 + $0x1], 1 }
 0x170   :  { %928 = vsyncpa [#allocation6], 1 }
 0x171   :  { %930 = vsyncpa [#allocation6 + $0x1], 1 }
 0x172   :  { %931 = vsyncpa [#allocation9], 1 }
 0x173   :  { %932 = vsyncpa [#allocation4], 1 }
 0x174   :  { %934 = vsyncpa [#allocation4 + $0x1], 1 }

</bundles_post_ra>
